<compile_context>
chip_gen: v5e
topology: v5e:2x2
jax: 0.10.0
libtpu: 0.0.40
codegen_flags: <defaults>
</compile_context>

<pallas_src>
import math
from functools import partial

import jax
import jax.numpy as jnp
from jax.experimental import pallas as pl
from jax.experimental.pallas import tpu as pltpu

# ---------------- config (small, consistent with BaiChuanConfig fields) ----------------
VOCAB = 256
HIDDEN = 32
NUM_HEADS = 4
HEAD_DIM = HIDDEN // NUM_HEADS
INTERMEDIATE = 64
NUM_LAYERS = 2
RMS_EPS = 1e-6
SEQ = 8

NEG_INF = -1e30  # finite "masked" value (diagonal is never masked, so row max is finite)


# ---------------- ALiBi slopes (verbatim port of _get_interleave / _get_alibi_slopes) --
def _get_interleave(n):
    def _get_interleave_power_of_2(n):
        start = 2 ** (-2 ** (-(math.log2(n) - 3)))
        ratio = start
        return [start * ratio ** i for i in range(n)]

    if math.log2(n).is_integer():
        return _get_interleave_power_of_2(n)
    else:
        closest_power_of_2 = 2 ** math.floor(math.log2(n))
        return (_get_interleave_power_of_2(closest_power_of_2)
                + _get_interleave(2 * closest_power_of_2)[0::2][: n - closest_power_of_2])


def _get_alibi_slopes(total_num_heads):
    return jnp.asarray(_get_interleave(total_num_heads), dtype=jnp.float32)


def build_alibi_causal_bias(num_heads, seq_len):
    """(num_heads, T, T) bias: slope * (j - i) for j <= i, NEG_INF otherwise."""
    slopes = _get_alibi_slopes(num_heads)                                  # (Hn,)
    pos = jnp.arange(seq_len, dtype=jnp.int32)
    rel = (pos[None, :] - pos[:, None]).astype(jnp.float32)                # (T, T): j - i
    bias = slopes[:, None, None] * rel[None, :, :]                         # (Hn, T, T)
    causal = (pos[None, :] <= pos[:, None])[None, :, :]                    # (1, T, T)
    return jnp.where(causal, bias, NEG_INF).astype(jnp.float32)


# ---------------- fused forward kernel ---------------------------------------------------
def _fused_forward_kernel(h_ref, bias_ref, in_ln_ref, post_ln_ref,
                          wq_ref, wk_ref, wv_ref, wo_ref,
                          gate_ref, up_ref, down_ref,
                          fnorm_ref, lm_ref, logits_ref,
                          *, num_layers, num_heads, eps, scale):
    f32 = jnp.float32

    def rmsnorm(x, w):  # x: (T, H) f32, w: (1, H)
        var = jnp.mean(x * x, axis=-1, keepdims=True)
        return x * jax.lax.rsqrt(var + eps) * w

    def mm(a, b):       # a @ b, f32 accumulation on the MXU
        return jax.lax.dot_general(a, b, (((1,), (0,)), ((), ())),
                                   preferred_element_type=f32)

    def mm_nt(a, b):    # a @ b.T
        return jax.lax.dot_general(a, b, (((1,), (1,)), ((), ())),
                                   preferred_element_type=f32)

    h = h_ref[...].astype(f32)                                   # (T, H)

    for l in range(num_layers):
        # ---------------- self-attention block ----------------
        residual = h
        x = rmsnorm(h, in_ln_ref[l])                              # input_layernorm
        attn_out = jnp.zeros_like(h)
        for hd in range(num_heads):
            q = mm(x, wq_ref[l, hd])                              # (T, D)
            k = mm(x, wk_ref[l, hd])                              # (T, D)
            v = mm(x, wv_ref[l, hd])                              # (T, D)
            s = mm_nt(q, k) * scale + bias_ref[hd]                # (T, T) ALiBi + causal
            m = jnp.max(s, axis=-1, keepdims=True)
            p = jnp.exp(s - m)
            denom = jnp.sum(p, axis=-1, keepdims=True)
            p = p * pl.reciprocal(denom, approx=True)             # EUP, ~free
            o = mm(p, v)                                          # (T, D)
            attn_out = attn_out + mm(o, wo_ref[l, hd])            # per-head o_proj slice
        h = residual + attn_out

        # ---------------- MLP block ----------------
        residual = h
        x = rmsnorm(h, post_ln_ref[l])                            # post_attention_layernorm
        gate = mm(x, gate_ref[l])                                 # (T, I)
        up = mm(x, up_ref[l])                                     # (T, I)
        act = gate * jax.nn.sigmoid(gate) * up                    # SiluAndMul
        h = residual + mm(act, down_ref[l])

    # ---------------- final norm + lm_head ----------------
    x = rmsnorm(h, fnorm_ref[...])
    logits_ref[...] = mm(x, lm_ref[...]).astype(logits_ref.dtype)


def fused_forward(hidden, bias, p):
    T = hidden.shape[0]
    kernel = partial(_fused_forward_kernel,
                     num_layers=NUM_LAYERS, num_heads=NUM_HEADS,
                     eps=RMS_EPS, scale=HEAD_DIM ** -0.5)
    vmem = pl.BlockSpec(memory_space=pltpu.MemorySpace.VMEM)
    args = (hidden, bias, p["in_ln"], p["post_ln"],
            p["wq"], p["wk"], p["wv"], p["wo"],
            p["gate"], p["up"], p["down"],
            p["final_norm"], p["lm_head"])
    return pl.pallas_call(
        kernel,
        out_shape=jax.ShapeDtypeStruct((T, VOCAB), jnp.float32),
        in_specs=[vmem] * len(args),
        out_specs=vmem,
    )(*args)


# ---------------- deterministic parameter init (shapes from module __init__) ------------
def init_params(key):
    ks = jax.random.split(key, 2 + NUM_LAYERS)

    def nrm(k, shape, scale=0.02):
        return scale * jax.random.normal(k, shape, dtype=jnp.float32)

    params = {
        "embed": nrm(ks[0], (VOCAB, HIDDEN)),            # VocabParallelEmbedding
        "lm_head": nrm(ks[1], (HIDDEN, VOCAB)),          # lm_head.weight^T
        "final_norm": jnp.ones((HIDDEN,), jnp.float32),
        "layers": [],
    }
    for i in range(NUM_LAYERS):
        lk = jax.random.split(ks[2 + i], 4)
        params["layers"].append(dict(
            input_ln=jnp.ones((HIDDEN,), jnp.float32),
            post_ln=jnp.ones((HIDDEN,), jnp.float32),
            w_pack=nrm(lk[0], (HIDDEN, 3 * HIDDEN)),        # W_pack^T     (y = x @ W)
            o_proj=nrm(lk[1], (HIDDEN, HIDDEN)),            # o_proj^T
            gate_up=nrm(lk[2], (HIDDEN, 2 * INTERMEDIATE)),  # gate_up_proj^T
            down=nrm(lk[3], (INTERMEDIATE, HIDDEN)),        # down_proj^T
        ))
    return params


def pack_params(params):
    """Repack layer weights into per-head / per-branch slabs for the fused kernel.
    Pure init-time host-side layout prep; numerically identical to the (H,3H)/(H,H)/(H,2I)
    formulation used by the PyTorch module."""
    def per_head_in(w):   # (H, H) -> (NUM_HEADS, H, HEAD_DIM): columns of head h
        return w.reshape(HIDDEN, NUM_HEADS, HEAD_DIM).transpose(1, 0, 2)

    wq, wk, wv, wo, gate, up, down, in_ln, post_ln = [], [], [], [], [], [], [], [], []
    for layer in params["layers"]:
        q_w, k_w, v_w = jnp.split(layer["w_pack"], 3, axis=-1)          # each (H, H)
        wq.append(per_head_in(q_w))
        wk.append(per_head_in(k_w))
        wv.append(per_head_in(v_w))
        wo.append(layer["o_proj"].reshape(NUM_HEADS, HEAD_DIM, HIDDEN))  # rows of head h
        g_w, u_w = jnp.split(layer["gate_up"], 2, axis=-1)               # each (H, I)
        gate.append(g_w)
        up.append(u_w)
        down.append(layer["down"])
        in_ln.append(layer["input_ln"].reshape(1, HIDDEN))
        post_ln.append(layer["post_ln"].reshape(1, HIDDEN))

    return dict(
        embed=params["embed"],
        lm_head=params["lm_head"],
        final_norm=params["final_norm"].reshape(1, HIDDEN),
        wq=jnp.stack(wq), wk=jnp.stack(wk), wv=jnp.stack(wv), wo=jnp.stack(wo),
        gate=jnp.stack(gate), up=jnp.stack(up), down=jnp.stack(down),
        in_ln=jnp.stack(in_ln), post_ln=jnp.stack(post_ln),
    )


# ---------------- forward (mirrors BaiChuanBaseForCausalLM.forward) ---------------------
def baichuan_forward(packed, input_ids, positions):
    # positions unused in the ALIBI path (matches BaichuanAttention.forward); prefill only.
    del positions
    T = input_ids.shape[0]
    hidden = jnp.take(packed["embed"], input_ids, axis=0)        # embedding gather (glue)
    bias = build_alibi_causal_bias(NUM_HEADS, T)                 # constant-folded under jit
    logits = fused_forward(hidden, bias, packed)                 # ONE fused Pallas call
    next_tokens = jnp.argmax(logits, axis=-1)                    # greedy Sampler (glue)
    return next_tokens, logits


# ---------------- main -------------------------------------------------------------------
if __name__ == "__main__":
    key = jax.random.PRNGKey(0)
    pkey, ikey = jax.random.split(key)
    packed = pack_params(init_params(pkey))

    input_ids = jax.random.randint(ikey, (SEQ,), 0, VOCAB, dtype=jnp.int32)
    positions = jnp.arange(SEQ, dtype=jnp.int32)

    next_tokens, logits = jax.jit(baichuan_forward)(packed, input_ids, positions)
    jax.block_until_ready((next_tokens, logits))

    assert next_tokens.shape == (SEQ,)
    assert logits.shape == (SEQ, VOCAB)
    print("KERNEL_OK")
</pallas_src>

<mosaic_0001>
module attributes {stable_mosaic.version = 11 : i64} {
  func.func @_fused_forward_kernel(%arg0: memref<8x32xf32, #tpu.memory_space<vmem>>, %arg1: memref<4x8x8xf32, #tpu.memory_space<vmem>>, %arg2: memref<2x1x32xf32, #tpu.memory_space<vmem>>, %arg3: memref<2x1x32xf32, #tpu.memory_space<vmem>>, %arg4: memref<2x4x32x8xf32, #tpu.memory_space<vmem>>, %arg5: memref<2x4x32x8xf32, #tpu.memory_space<vmem>>, %arg6: memref<2x4x32x8xf32, #tpu.memory_space<vmem>>, %arg7: memref<2x4x8x32xf32, #tpu.memory_space<vmem>>, %arg8: memref<2x32x64xf32, #tpu.memory_space<vmem>>, %arg9: memref<2x32x64xf32, #tpu.memory_space<vmem>>, %arg10: memref<2x64x32xf32, #tpu.memory_space<vmem>>, %arg11: memref<1x32xf32, #tpu.memory_space<vmem>>, %arg12: memref<32x256xf32, #tpu.memory_space<vmem>>, %arg13: memref<8x256xf32, #tpu.memory_space<vmem>>) attributes {dimension_semantics = [], scalar_prefetch = 0 : i64, scratch_operands = 0 : i64, tpu.core_type = #tpu.core_type<tc>} {
    %c0 = arith.constant 0 : index
    %c0_0 = arith.constant 0 : index
    %0 = vector.load %arg0[%c0, %c0_0] : memref<8x32xf32, #tpu.memory_space<vmem>>, vector<8x32xf32>
    %c0_1 = arith.constant 0 : index
    %c0_2 = arith.constant 0 : index
    %c0_3 = arith.constant 0 : index
    %1 = vector.load %arg2[%c0_1, %c0_2, %c0_3] : memref<2x1x32xf32, #tpu.memory_space<vmem>>, vector<1x1x32xf32>
    %2 = vector.shape_cast %1 : vector<1x1x32xf32> to vector<1x32xf32>
    %3 = arith.mulf %0, %0 : vector<8x32xf32>
    %cst = arith.constant dense<0.000000e+00> : vector<8xf32>
    %4 = vector.multi_reduction <add>, %3, %cst [1] : vector<8x32xf32> to vector<8xf32>
    %5 = vector.shape_cast %4 : vector<8xf32> to vector<8x1xf32>
    %cst_4 = arith.constant 3.200000e+01 : f32
    %6 = vector.broadcast %cst_4 : f32 to vector<8x1xf32>
    %7 = arith.divf %5, %6 : vector<8x1xf32>
    %cst_5 = arith.constant 9.99999997E-7 : f32
    %8 = vector.broadcast %cst_5 : f32 to vector<8x1xf32>
    %9 = arith.addf %7, %8 : vector<8x1xf32>
    %10 = math.rsqrt %9 : vector<8x1xf32>
    %11 = vector.broadcast %10 : vector<8x1xf32> to vector<8x32xf32>
    %12 = arith.mulf %0, %11 : vector<8x32xf32>
    %13 = vector.broadcast %2 : vector<1x32xf32> to vector<8x32xf32>
    %14 = arith.mulf %12, %13 : vector<8x32xf32>
    %cst_6 = arith.constant 0.000000e+00 : f32
    %15 = vector.broadcast %cst_6 : f32 to vector<8x32xf32>
    %c0_7 = arith.constant 0 : index
    %c0_8 = arith.constant 0 : index
    %c0_9 = arith.constant 0 : index
    %c0_10 = arith.constant 0 : index
    %16 = vector.load %arg4[%c0_7, %c0_8, %c0_9, %c0_10] : memref<2x4x32x8xf32, #tpu.memory_space<vmem>>, vector<1x1x32x8xf32>
    %17 = vector.shape_cast %16 : vector<1x1x32x8xf32> to vector<32x8xf32>
    %cst_11 = arith.constant dense<0.000000e+00> : vector<8x8xf32>
    %18 = tpu.matmul %14, %17, %cst_11 {dimension_numbers = #tpu.dot_dimension_numbers<[1], [0], [0], [1], [0, 0, 1, 1], [], []>} : vector<8x32xf32>, vector<32x8xf32>, vector<8x8xf32> -> vector<8x8xf32>
    %c0_12 = arith.constant 0 : index
    %c0_13 = arith.constant 0 : index
    %c0_14 = arith.constant 0 : index
    %c0_15 = arith.constant 0 : index
    %19 = vector.load %arg5[%c0_12, %c0_13, %c0_14, %c0_15] : memref<2x4x32x8xf32, #tpu.memory_space<vmem>>, vector<1x1x32x8xf32>
    %20 = vector.shape_cast %19 : vector<1x1x32x8xf32> to vector<32x8xf32>
    %cst_16 = arith.constant dense<0.000000e+00> : vector<8x8xf32>
    %21 = tpu.matmul %14, %20, %cst_16 {dimension_numbers = #tpu.dot_dimension_numbers<[1], [0], [0], [1], [0, 0, 1, 1], [], []>} : vector<8x32xf32>, vector<32x8xf32>, vector<8x8xf32> -> vector<8x8xf32>
    %c0_17 = arith.constant 0 : index
    %c0_18 = arith.constant 0 : index
    %c0_19 = arith.constant 0 : index
    %c0_20 = arith.constant 0 : index
    %22 = vector.load %arg6[%c0_17, %c0_18, %c0_19, %c0_20] : memref<2x4x32x8xf32, #tpu.memory_space<vmem>>, vector<1x1x32x8xf32>
    %23 = vector.shape_cast %22 : vector<1x1x32x8xf32> to vector<32x8xf32>
    %cst_21 = arith.constant dense<0.000000e+00> : vector<8x8xf32>
    %24 = tpu.matmul %14, %23, %cst_21 {dimension_numbers = #tpu.dot_dimension_numbers<[1], [0], [0], [1], [0, 0, 1, 1], [], []>} : vector<8x32xf32>, vector<32x8xf32>, vector<8x8xf32> -> vector<8x8xf32>
    %cst_22 = arith.constant dense<0.000000e+00> : vector<8x8xf32>
    %25 = tpu.matmul %18, %21, %cst_22 {dimension_numbers = #tpu.dot_dimension_numbers<[1], [1], [0], [0], [0, 0, 1, 0], [], []>} : vector<8x8xf32>, vector<8x8xf32>, vector<8x8xf32> -> vector<8x8xf32>
    %cst_23 = arith.constant 0.353553385 : f32
    %26 = vector.broadcast %cst_23 : f32 to vector<8x8xf32>
    %27 = arith.mulf %25, %26 : vector<8x8xf32>
    %c0_24 = arith.constant 0 : index
    %c0_25 = arith.constant 0 : index
    %c0_26 = arith.constant 0 : index
    %28 = vector.load %arg1[%c0_24, %c0_25, %c0_26] : memref<4x8x8xf32, #tpu.memory_space<vmem>>, vector<1x8x8xf32>
    %29 = vector.shape_cast %28 : vector<1x8x8xf32> to vector<8x8xf32>
    %30 = arith.addf %27, %29 : vector<8x8xf32>
    %cst_27 = arith.constant dense<0xFF800000> : vector<8xf32>
    %31 = vector.multi_reduction <maximumf>, %30, %cst_27 [1] : vector<8x8xf32> to vector<8xf32>
    %32 = vector.shape_cast %31 : vector<8xf32> to vector<8x1xf32>
    %33 = vector.broadcast %32 : vector<8x1xf32> to vector<8x8xf32>
    %34 = arith.subf %30, %33 : vector<8x8xf32>
    %35 = math.exp %34 : vector<8x8xf32>
    %cst_28 = arith.constant dense<0.000000e+00> : vector<8xf32>
    %36 = vector.multi_reduction <add>, %35, %cst_28 [1] : vector<8x8xf32> to vector<8xf32>
    %37 = vector.shape_cast %36 : vector<8xf32> to vector<8x1xf32>
    %38 = tpu.reciprocal %37 {approx = true} : vector<8x1xf32> -> vector<8x1xf32>
    %39 = vector.broadcast %38 : vector<8x1xf32> to vector<8x8xf32>
    %40 = arith.mulf %35, %39 : vector<8x8xf32>
    %cst_29 = arith.constant dense<0.000000e+00> : vector<8x8xf32>
    %41 = tpu.matmul %40, %24, %cst_29 {dimension_numbers = #tpu.dot_dimension_numbers<[1], [0], [0], [1], [0, 0, 1, 1], [], []>} : vector<8x8xf32>, vector<8x8xf32>, vector<8x8xf32> -> vector<8x8xf32>
    %c0_30 = arith.constant 0 : index
    %c0_31 = arith.constant 0 : index
    %c0_32 = arith.constant 0 : index
    %c0_33 = arith.constant 0 : index
    %42 = vector.load %arg7[%c0_30, %c0_31, %c0_32, %c0_33] : memref<2x4x8x32xf32, #tpu.memory_space<vmem>>, vector<1x1x8x32xf32>
    %43 = vector.shape_cast %42 : vector<1x1x8x32xf32> to vector<8x32xf32>
    %cst_34 = arith.constant dense<0.000000e+00> : vector<8x32xf32>
    %44 = tpu.matmul %41, %43, %cst_34 {dimension_numbers = #tpu.dot_dimension_numbers<[1], [0], [0], [1], [0, 0, 1, 1], [], []>} : vector<8x8xf32>, vector<8x32xf32>, vector<8x32xf32> -> vector<8x32xf32>
    %45 = arith.addf %15, %44 : vector<8x32xf32>
    %c0_35 = arith.constant 0 : index
    %c1 = arith.constant 1 : index
    %c0_36 = arith.constant 0 : index
    %c0_37 = arith.constant 0 : index
    %46 = vector.load %arg4[%c0_35, %c1, %c0_36, %c0_37] : memref<2x4x32x8xf32, #tpu.memory_space<vmem>>, vector<1x1x32x8xf32>
    %47 = vector.shape_cast %46 : vector<1x1x32x8xf32> to vector<32x8xf32>
    %cst_38 = arith.constant dense<0.000000e+00> : vector<8x8xf32>
    %48 = tpu.matmul %14, %47, %cst_38 {dimension_numbers = #tpu.dot_dimension_numbers<[1], [0], [0], [1], [0, 0, 1, 1], [], []>} : vector<8x32xf32>, vector<32x8xf32>, vector<8x8xf32> -> vector<8x8xf32>
    %c0_39 = arith.constant 0 : index
    %c1_40 = arith.constant 1 : index
    %c0_41 = arith.constant 0 : index
    %c0_42 = arith.constant 0 : index
    %49 = vector.load %arg5[%c0_39, %c1_40, %c0_41, %c0_42] : memref<2x4x32x8xf32, #tpu.memory_space<vmem>>, vector<1x1x32x8xf32>
    %50 = vector.shape_cast %49 : vector<1x1x32x8xf32> to vector<32x8xf32>
    %cst_43 = arith.constant dense<0.000000e+00> : vector<8x8xf32>
    %51 = tpu.matmul %14, %50, %cst_43 {dimension_numbers = #tpu.dot_dimension_numbers<[1], [0], [0], [1], [0, 0, 1, 1], [], []>} : vector<8x32xf32>, vector<32x8xf32>, vector<8x8xf32> -> vector<8x8xf32>
    %c0_44 = arith.constant 0 : index
    %c1_45 = arith.constant 1 : index
    %c0_46 = arith.constant 0 : index
    %c0_47 = arith.constant 0 : index
    %52 = vector.load %arg6[%c0_44, %c1_45, %c0_46, %c0_47] : memref<2x4x32x8xf32, #tpu.memory_space<vmem>>, vector<1x1x32x8xf32>
    %53 = vector.shape_cast %52 : vector<1x1x32x8xf32> to vector<32x8xf32>
    %cst_48 = arith.constant dense<0.000000e+00> : vector<8x8xf32>
    %54 = tpu.matmul %14, %53, %cst_48 {dimension_numbers = #tpu.dot_dimension_numbers<[1], [0], [0], [1], [0, 0, 1, 1], [], []>} : vector<8x32xf32>, vector<32x8xf32>, vector<8x8xf32> -> vector<8x8xf32>
    %cst_49 = arith.constant dense<0.000000e+00> : vector<8x8xf32>
    %55 = tpu.matmul %48, %51, %cst_49 {dimension_numbers = #tpu.dot_dimension_numbers<[1], [1], [0], [0], [0, 0, 1, 0], [], []>} : vector<8x8xf32>, vector<8x8xf32>, vector<8x8xf32> -> vector<8x8xf32>
    %cst_50 = arith.constant 0.353553385 : f32
    %56 = vector.broadcast %cst_50 : f32 to vector<8x8xf32>
    %57 = arith.mulf %55, %56 : vector<8x8xf32>
    %c1_51 = arith.constant 1 : index
    %c0_52 = arith.constant 0 : index
    %c0_53 = arith.constant 0 : index
    %58 = vector.load %arg1[%c1_51, %c0_52, %c0_53] : memref<4x8x8xf32, #tpu.memory_space<vmem>>, vector<1x8x8xf32>
    %59 = vector.shape_cast %58 : vector<1x8x8xf32> to vector<8x8xf32>
    %60 = arith.addf %57, %59 : vector<8x8xf32>
    %cst_54 = arith.constant dense<0xFF800000> : vector<8xf32>
    %61 = vector.multi_reduction <maximumf>, %60, %cst_54 [1] : vector<8x8xf32> to vector<8xf32>
    %62 = vector.shape_cast %61 : vector<8xf32> to vector<8x1xf32>
    %63 = vector.broadcast %62 : vector<8x1xf32> to vector<8x8xf32>
    %64 = arith.subf %60, %63 : vector<8x8xf32>
    %65 = math.exp %64 : vector<8x8xf32>
    %cst_55 = arith.constant dense<0.000000e+00> : vector<8xf32>
    %66 = vector.multi_reduction <add>, %65, %cst_55 [1] : vector<8x8xf32> to vector<8xf32>
    %67 = vector.shape_cast %66 : vector<8xf32> to vector<8x1xf32>
    %68 = tpu.reciprocal %67 {approx = true} : vector<8x1xf32> -> vector<8x1xf32>
    %69 = vector.broadcast %68 : vector<8x1xf32> to vector<8x8xf32>
    %70 = arith.mulf %65, %69 : vector<8x8xf32>
    %cst_56 = arith.constant dense<0.000000e+00> : vector<8x8xf32>
    %71 = tpu.matmul %70, %54, %cst_56 {dimension_numbers = #tpu.dot_dimension_numbers<[1], [0], [0], [1], [0, 0, 1, 1], [], []>} : vector<8x8xf32>, vector<8x8xf32>, vector<8x8xf32> -> vector<8x8xf32>
    %c0_57 = arith.constant 0 : index
    %c1_58 = arith.constant 1 : index
    %c0_59 = arith.constant 0 : index
    %c0_60 = arith.constant 0 : index
    %72 = vector.load %arg7[%c0_57, %c1_58, %c0_59, %c0_60] : memref<2x4x8x32xf32, #tpu.memory_space<vmem>>, vector<1x1x8x32xf32>
    %73 = vector.shape_cast %72 : vector<1x1x8x32xf32> to vector<8x32xf32>
    %cst_61 = arith.constant dense<0.000000e+00> : vector<8x32xf32>
    %74 = tpu.matmul %71, %73, %cst_61 {dimension_numbers = #tpu.dot_dimension_numbers<[1], [0], [0], [1], [0, 0, 1, 1], [], []>} : vector<8x8xf32>, vector<8x32xf32>, vector<8x32xf32> -> vector<8x32xf32>
    %75 = arith.addf %45, %74 : vector<8x32xf32>
    %c0_62 = arith.constant 0 : index
    %c2 = arith.constant 2 : index
    %c0_63 = arith.constant 0 : index
    %c0_64 = arith.constant 0 : index
    %76 = vector.load %arg4[%c0_62, %c2, %c0_63, %c0_64] : memref<2x4x32x8xf32, #tpu.memory_space<vmem>>, vector<1x1x32x8xf32>
    %77 = vector.shape_cast %76 : vector<1x1x32x8xf32> to vector<32x8xf32>
    %cst_65 = arith.constant dense<0.000000e+00> : vector<8x8xf32>
    %78 = tpu.matmul %14, %77, %cst_65 {dimension_numbers = #tpu.dot_dimension_numbers<[1], [0], [0], [1], [0, 0, 1, 1], [], []>} : vector<8x32xf32>, vector<32x8xf32>, vector<8x8xf32> -> vector<8x8xf32>
    %c0_66 = arith.constant 0 : index
    %c2_67 = arith.constant 2 : index
    %c0_68 = arith.constant 0 : index
    %c0_69 = arith.constant 0 : index
    %79 = vector.load %arg5[%c0_66, %c2_67, %c0_68, %c0_69] : memref<2x4x32x8xf32, #tpu.memory_space<vmem>>, vector<1x1x32x8xf32>
    %80 = vector.shape_cast %79 : vector<1x1x32x8xf32> to vector<32x8xf32>
    %cst_70 = arith.constant dense<0.000000e+00> : vector<8x8xf32>
    %81 = tpu.matmul %14, %80, %cst_70 {dimension_numbers = #tpu.dot_dimension_numbers<[1], [0], [0], [1], [0, 0, 1, 1], [], []>} : vector<8x32xf32>, vector<32x8xf32>, vector<8x8xf32> -> vector<8x8xf32>
    %c0_71 = arith.constant 0 : index
    %c2_72 = arith.constant 2 : index
    %c0_73 = arith.constant 0 : index
    %c0_74 = arith.constant 0 : index
    %82 = vector.load %arg6[%c0_71, %c2_72, %c0_73, %c0_74] : memref<2x4x32x8xf32, #tpu.memory_space<vmem>>, vector<1x1x32x8xf32>
    %83 = vector.shape_cast %82 : vector<1x1x32x8xf32> to vector<32x8xf32>
    %cst_75 = arith.constant dense<0.000000e+00> : vector<8x8xf32>
    %84 = tpu.matmul %14, %83, %cst_75 {dimension_numbers = #tpu.dot_dimension_numbers<[1], [0], [0], [1], [0, 0, 1, 1], [], []>} : vector<8x32xf32>, vector<32x8xf32>, vector<8x8xf32> -> vector<8x8xf32>
    %cst_76 = arith.constant dense<0.000000e+00> : vector<8x8xf32>
    %85 = tpu.matmul %78, %81, %cst_76 {dimension_numbers = #tpu.dot_dimension_numbers<[1], [1], [0], [0], [0, 0, 1, 0], [], []>} : vector<8x8xf32>, vector<8x8xf32>, vector<8x8xf32> -> vector<8x8xf32>
    %cst_77 = arith.constant 0.353553385 : f32
    %86 = vector.broadcast %cst_77 : f32 to vector<8x8xf32>
    %87 = arith.mulf %85, %86 : vector<8x8xf32>
    %c2_78 = arith.constant 2 : index
    %c0_79 = arith.constant 0 : index
    %c0_80 = arith.constant 0 : index
    %88 = vector.load %arg1[%c2_78, %c0_79, %c0_80] : memref<4x8x8xf32, #tpu.memory_space<vmem>>, vector<1x8x8xf32>
    %89 = vector.shape_cast %88 : vector<1x8x8xf32> to vector<8x8xf32>
    %90 = arith.addf %87, %89 : vector<8x8xf32>
    %cst_81 = arith.constant dense<0xFF800000> : vector<8xf32>
    %91 = vector.multi_reduction <maximumf>, %90, %cst_81 [1] : vector<8x8xf32> to vector<8xf32>
    %92 = vector.shape_cast %91 : vector<8xf32> to vector<8x1xf32>
    %93 = vector.broadcast %92 : vector<8x1xf32> to vector<8x8xf32>
    %94 = arith.subf %90, %93 : vector<8x8xf32>
    %95 = math.exp %94 : vector<8x8xf32>
    %cst_82 = arith.constant dense<0.000000e+00> : vector<8xf32>
    %96 = vector.multi_reduction <add>, %95, %cst_82 [1] : vector<8x8xf32> to vector<8xf32>
    %97 = vector.shape_cast %96 : vector<8xf32> to vector<8x1xf32>
    %98 = tpu.reciprocal %97 {approx = true} : vector<8x1xf32> -> vector<8x1xf32>
    %99 = vector.broadcast %98 : vector<8x1xf32> to vector<8x8xf32>
    %100 = arith.mulf %95, %99 : vector<8x8xf32>
    %cst_83 = arith.constant dense<0.000000e+00> : vector<8x8xf32>
    %101 = tpu.matmul %100, %84, %cst_83 {dimension_numbers = #tpu.dot_dimension_numbers<[1], [0], [0], [1], [0, 0, 1, 1], [], []>} : vector<8x8xf32>, vector<8x8xf32>, vector<8x8xf32> -> vector<8x8xf32>
    %c0_84 = arith.constant 0 : index
    %c2_85 = arith.constant 2 : index
    %c0_86 = arith.constant 0 : index
    %c0_87 = arith.constant 0 : index
    %102 = vector.load %arg7[%c0_84, %c2_85, %c0_86, %c0_87] : memref<2x4x8x32xf32, #tpu.memory_space<vmem>>, vector<1x1x8x32xf32>
    %103 = vector.shape_cast %102 : vector<1x1x8x32xf32> to vector<8x32xf32>
    %cst_88 = arith.constant dense<0.000000e+00> : vector<8x32xf32>
    %104 = tpu.matmul %101, %103, %cst_88 {dimension_numbers = #tpu.dot_dimension_numbers<[1], [0], [0], [1], [0, 0, 1, 1], [], []>} : vector<8x8xf32>, vector<8x32xf32>, vector<8x32xf32> -> vector<8x32xf32>
    %105 = arith.addf %75, %104 : vector<8x32xf32>
    %c0_89 = arith.constant 0 : index
    %c3 = arith.constant 3 : index
    %c0_90 = arith.constant 0 : index
    %c0_91 = arith.constant 0 : index
    %106 = vector.load %arg4[%c0_89, %c3, %c0_90, %c0_91] : memref<2x4x32x8xf32, #tpu.memory_space<vmem>>, vector<1x1x32x8xf32>
    %107 = vector.shape_cast %106 : vector<1x1x32x8xf32> to vector<32x8xf32>
    %cst_92 = arith.constant dense<0.000000e+00> : vector<8x8xf32>
    %108 = tpu.matmul %14, %107, %cst_92 {dimension_numbers = #tpu.dot_dimension_numbers<[1], [0], [0], [1], [0, 0, 1, 1], [], []>} : vector<8x32xf32>, vector<32x8xf32>, vector<8x8xf32> -> vector<8x8xf32>
    %c0_93 = arith.constant 0 : index
    %c3_94 = arith.constant 3 : index
    %c0_95 = arith.constant 0 : index
    %c0_96 = arith.constant 0 : index
    %109 = vector.load %arg5[%c0_93, %c3_94, %c0_95, %c0_96] : memref<2x4x32x8xf32, #tpu.memory_space<vmem>>, vector<1x1x32x8xf32>
    %110 = vector.shape_cast %109 : vector<1x1x32x8xf32> to vector<32x8xf32>
    %cst_97 = arith.constant dense<0.000000e+00> : vector<8x8xf32>
    %111 = tpu.matmul %14, %110, %cst_97 {dimension_numbers = #tpu.dot_dimension_numbers<[1], [0], [0], [1], [0, 0, 1, 1], [], []>} : vector<8x32xf32>, vector<32x8xf32>, vector<8x8xf32> -> vector<8x8xf32>
    %c0_98 = arith.constant 0 : index
    %c3_99 = arith.constant 3 : index
    %c0_100 = arith.constant 0 : index
    %c0_101 = arith.constant 0 : index
    %112 = vector.load %arg6[%c0_98, %c3_99, %c0_100, %c0_101] : memref<2x4x32x8xf32, #tpu.memory_space<vmem>>, vector<1x1x32x8xf32>
    %113 = vector.shape_cast %112 : vector<1x1x32x8xf32> to vector<32x8xf32>
    %cst_102 = arith.constant dense<0.000000e+00> : vector<8x8xf32>
    %114 = tpu.matmul %14, %113, %cst_102 {dimension_numbers = #tpu.dot_dimension_numbers<[1], [0], [0], [1], [0, 0, 1, 1], [], []>} : vector<8x32xf32>, vector<32x8xf32>, vector<8x8xf32> -> vector<8x8xf32>
    %cst_103 = arith.constant dense<0.000000e+00> : vector<8x8xf32>
    %115 = tpu.matmul %108, %111, %cst_103 {dimension_numbers = #tpu.dot_dimension_numbers<[1], [1], [0], [0], [0, 0, 1, 0], [], []>} : vector<8x8xf32>, vector<8x8xf32>, vector<8x8xf32> -> vector<8x8xf32>
    %cst_104 = arith.constant 0.353553385 : f32
    %116 = vector.broadcast %cst_104 : f32 to vector<8x8xf32>
    %117 = arith.mulf %115, %116 : vector<8x8xf32>
    %c3_105 = arith.constant 3 : index
    %c0_106 = arith.constant 0 : index
    %c0_107 = arith.constant 0 : index
    %118 = vector.load %arg1[%c3_105, %c0_106, %c0_107] : memref<4x8x8xf32, #tpu.memory_space<vmem>>, vector<1x8x8xf32>
    %119 = vector.shape_cast %118 : vector<1x8x8xf32> to vector<8x8xf32>
    %120 = arith.addf %117, %119 : vector<8x8xf32>
    %cst_108 = arith.constant dense<0xFF800000> : vector<8xf32>
    %121 = vector.multi_reduction <maximumf>, %120, %cst_108 [1] : vector<8x8xf32> to vector<8xf32>
    %122 = vector.shape_cast %121 : vector<8xf32> to vector<8x1xf32>
    %123 = vector.broadcast %122 : vector<8x1xf32> to vector<8x8xf32>
    %124 = arith.subf %120, %123 : vector<8x8xf32>
    %125 = math.exp %124 : vector<8x8xf32>
    %cst_109 = arith.constant dense<0.000000e+00> : vector<8xf32>
    %126 = vector.multi_reduction <add>, %125, %cst_109 [1] : vector<8x8xf32> to vector<8xf32>
    %127 = vector.shape_cast %126 : vector<8xf32> to vector<8x1xf32>
    %128 = tpu.reciprocal %127 {approx = true} : vector<8x1xf32> -> vector<8x1xf32>
    %129 = vector.broadcast %128 : vector<8x1xf32> to vector<8x8xf32>
    %130 = arith.mulf %125, %129 : vector<8x8xf32>
    %cst_110 = arith.constant dense<0.000000e+00> : vector<8x8xf32>
    %131 = tpu.matmul %130, %114, %cst_110 {dimension_numbers = #tpu.dot_dimension_numbers<[1], [0], [0], [1], [0, 0, 1, 1], [], []>} : vector<8x8xf32>, vector<8x8xf32>, vector<8x8xf32> -> vector<8x8xf32>
    %c0_111 = arith.constant 0 : index
    %c3_112 = arith.constant 3 : index
    %c0_113 = arith.constant 0 : index
    %c0_114 = arith.constant 0 : index
    %132 = vector.load %arg7[%c0_111, %c3_112, %c0_113, %c0_114] : memref<2x4x8x32xf32, #tpu.memory_space<vmem>>, vector<1x1x8x32xf32>
    %133 = vector.shape_cast %132 : vector<1x1x8x32xf32> to vector<8x32xf32>
    %cst_115 = arith.constant dense<0.000000e+00> : vector<8x32xf32>
    %134 = tpu.matmul %131, %133, %cst_115 {dimension_numbers = #tpu.dot_dimension_numbers<[1], [0], [0], [1], [0, 0, 1, 1], [], []>} : vector<8x8xf32>, vector<8x32xf32>, vector<8x32xf32> -> vector<8x32xf32>
    %135 = arith.addf %105, %134 : vector<8x32xf32>
    %136 = arith.addf %0, %135 : vector<8x32xf32>
    %c0_116 = arith.constant 0 : index
    %c0_117 = arith.constant 0 : index
    %c0_118 = arith.constant 0 : index
    %137 = vector.load %arg3[%c0_116, %c0_117, %c0_118] : memref<2x1x32xf32, #tpu.memory_space<vmem>>, vector<1x1x32xf32>
    %138 = vector.shape_cast %137 : vector<1x1x32xf32> to vector<1x32xf32>
    %139 = arith.mulf %136, %136 : vector<8x32xf32>
    %cst_119 = arith.constant dense<0.000000e+00> : vector<8xf32>
    %140 = vector.multi_reduction <add>, %139, %cst_119 [1] : vector<8x32xf32> to vector<8xf32>
    %141 = vector.shape_cast %140 : vector<8xf32> to vector<8x1xf32>
    %cst_120 = arith.constant 3.200000e+01 : f32
    %142 = vector.broadcast %cst_120 : f32 to vector<8x1xf32>
    %143 = arith.divf %141, %142 : vector<8x1xf32>
    %cst_121 = arith.constant 9.99999997E-7 : f32
    %144 = vector.broadcast %cst_121 : f32 to vector<8x1xf32>
    %145 = arith.addf %143, %144 : vector<8x1xf32>
    %146 = math.rsqrt %145 : vector<8x1xf32>
    %147 = vector.broadcast %146 : vector<8x1xf32> to vector<8x32xf32>
    %148 = arith.mulf %136, %147 : vector<8x32xf32>
    %149 = vector.broadcast %138 : vector<1x32xf32> to vector<8x32xf32>
    %150 = arith.mulf %148, %149 : vector<8x32xf32>
    %c0_122 = arith.constant 0 : index
    %c0_123 = arith.constant 0 : index
    %c0_124 = arith.constant 0 : index
    %151 = vector.load %arg8[%c0_122, %c0_123, %c0_124] : memref<2x32x64xf32, #tpu.memory_space<vmem>>, vector<1x32x64xf32>
    %152 = vector.shape_cast %151 : vector<1x32x64xf32> to vector<32x64xf32>
    %cst_125 = arith.constant dense<0.000000e+00> : vector<8x64xf32>
    %153 = tpu.matmul %150, %152, %cst_125 {dimension_numbers = #tpu.dot_dimension_numbers<[1], [0], [0], [1], [0, 0, 1, 1], [], []>} : vector<8x32xf32>, vector<32x64xf32>, vector<8x64xf32> -> vector<8x64xf32>
    %c0_126 = arith.constant 0 : index
    %c0_127 = arith.constant 0 : index
    %c0_128 = arith.constant 0 : index
    %154 = vector.load %arg9[%c0_126, %c0_127, %c0_128] : memref<2x32x64xf32, #tpu.memory_space<vmem>>, vector<1x32x64xf32>
    %155 = vector.shape_cast %154 : vector<1x32x64xf32> to vector<32x64xf32>
    %cst_129 = arith.constant dense<0.000000e+00> : vector<8x64xf32>
    %156 = tpu.matmul %150, %155, %cst_129 {dimension_numbers = #tpu.dot_dimension_numbers<[1], [0], [0], [1], [0, 0, 1, 1], [], []>} : vector<8x32xf32>, vector<32x64xf32>, vector<8x64xf32> -> vector<8x64xf32>
    %157 = arith.negf %153 : vector<8x64xf32>
    %158 = math.exp %157 : vector<8x64xf32>
    %cst_130 = arith.constant 1.000000e+00 : f32
    %159 = vector.broadcast %cst_130 : f32 to vector<8x64xf32>
    %160 = arith.addf %159, %158 : vector<8x64xf32>
    %161 = arith.divf %159, %160 : vector<8x64xf32>
    %162 = arith.mulf %153, %161 : vector<8x64xf32>
    %163 = arith.mulf %162, %156 : vector<8x64xf32>
    %c0_131 = arith.constant 0 : index
    %c0_132 = arith.constant 0 : index
    %c0_133 = arith.constant 0 : index
    %164 = vector.load %arg10[%c0_131, %c0_132, %c0_133] : memref<2x64x32xf32, #tpu.memory_space<vmem>>, vector<1x64x32xf32>
    %165 = vector.shape_cast %164 : vector<1x64x32xf32> to vector<64x32xf32>
    %cst_134 = arith.constant dense<0.000000e+00> : vector<8x32xf32>
    %166 = tpu.matmul %163, %165, %cst_134 {dimension_numbers = #tpu.dot_dimension_numbers<[1], [0], [0], [1], [0, 0, 1, 1], [], []>} : vector<8x64xf32>, vector<64x32xf32>, vector<8x32xf32> -> vector<8x32xf32>
    %167 = arith.addf %136, %166 : vector<8x32xf32>
    %c1_135 = arith.constant 1 : index
    %c0_136 = arith.constant 0 : index
    %c0_137 = arith.constant 0 : index
    %168 = vector.load %arg2[%c1_135, %c0_136, %c0_137] : memref<2x1x32xf32, #tpu.memory_space<vmem>>, vector<1x1x32xf32>
    %169 = vector.shape_cast %168 : vector<1x1x32xf32> to vector<1x32xf32>
    %170 = arith.mulf %167, %167 : vector<8x32xf32>
    %cst_138 = arith.constant dense<0.000000e+00> : vector<8xf32>
    %171 = vector.multi_reduction <add>, %170, %cst_138 [1] : vector<8x32xf32> to vector<8xf32>
    %172 = vector.shape_cast %171 : vector<8xf32> to vector<8x1xf32>
    %cst_139 = arith.constant 3.200000e+01 : f32
    %173 = vector.broadcast %cst_139 : f32 to vector<8x1xf32>
    %174 = arith.divf %172, %173 : vector<8x1xf32>
    %cst_140 = arith.constant 9.99999997E-7 : f32
    %175 = vector.broadcast %cst_140 : f32 to vector<8x1xf32>
    %176 = arith.addf %174, %175 : vector<8x1xf32>
    %177 = math.rsqrt %176 : vector<8x1xf32>
    %178 = vector.broadcast %177 : vector<8x1xf32> to vector<8x32xf32>
    %179 = arith.mulf %167, %178 : vector<8x32xf32>
    %180 = vector.broadcast %169 : vector<1x32xf32> to vector<8x32xf32>
    %181 = arith.mulf %179, %180 : vector<8x32xf32>
    %cst_141 = arith.constant 0.000000e+00 : f32
    %182 = vector.broadcast %cst_141 : f32 to vector<8x32xf32>
    %c1_142 = arith.constant 1 : index
    %c0_143 = arith.constant 0 : index
    %c0_144 = arith.constant 0 : index
    %c0_145 = arith.constant 0 : index
    %183 = vector.load %arg4[%c1_142, %c0_143, %c0_144, %c0_145] : memref<2x4x32x8xf32, #tpu.memory_space<vmem>>, vector<1x1x32x8xf32>
    %184 = vector.shape_cast %183 : vector<1x1x32x8xf32> to vector<32x8xf32>
    %cst_146 = arith.constant dense<0.000000e+00> : vector<8x8xf32>
    %185 = tpu.matmul %181, %184, %cst_146 {dimension_numbers = #tpu.dot_dimension_numbers<[1], [0], [0], [1], [0, 0, 1, 1], [], []>} : vector<8x32xf32>, vector<32x8xf32>, vector<8x8xf32> -> vector<8x8xf32>
    %c1_147 = arith.constant 1 : index
    %c0_148 = arith.constant 0 : index
    %c0_149 = arith.constant 0 : index
    %c0_150 = arith.constant 0 : index
    %186 = vector.load %arg5[%c1_147, %c0_148, %c0_149, %c0_150] : memref<2x4x32x8xf32, #tpu.memory_space<vmem>>, vector<1x1x32x8xf32>
    %187 = vector.shape_cast %186 : vector<1x1x32x8xf32> to vector<32x8xf32>
    %cst_151 = arith.constant dense<0.000000e+00> : vector<8x8xf32>
    %188 = tpu.matmul %181, %187, %cst_151 {dimension_numbers = #tpu.dot_dimension_numbers<[1], [0], [0], [1], [0, 0, 1, 1], [], []>} : vector<8x32xf32>, vector<32x8xf32>, vector<8x8xf32> -> vector<8x8xf32>
    %c1_152 = arith.constant 1 : index
    %c0_153 = arith.constant 0 : index
    %c0_154 = arith.constant 0 : index
    %c0_155 = arith.constant 0 : index
    %189 = vector.load %arg6[%c1_152, %c0_153, %c0_154, %c0_155] : memref<2x4x32x8xf32, #tpu.memory_space<vmem>>, vector<1x1x32x8xf32>
    %190 = vector.shape_cast %189 : vector<1x1x32x8xf32> to vector<32x8xf32>
    %cst_156 = arith.constant dense<0.000000e+00> : vector<8x8xf32>
    %191 = tpu.matmul %181, %190, %cst_156 {dimension_numbers = #tpu.dot_dimension_numbers<[1], [0], [0], [1], [0, 0, 1, 1], [], []>} : vector<8x32xf32>, vector<32x8xf32>, vector<8x8xf32> -> vector<8x8xf32>
    %cst_157 = arith.constant dense<0.000000e+00> : vector<8x8xf32>
    %192 = tpu.matmul %185, %188, %cst_157 {dimension_numbers = #tpu.dot_dimension_numbers<[1], [1], [0], [0], [0, 0, 1, 0], [], []>} : vector<8x8xf32>, vector<8x8xf32>, vector<8x8xf32> -> vector<8x8xf32>
    %cst_158 = arith.constant 0.353553385 : f32
    %193 = vector.broadcast %cst_158 : f32 to vector<8x8xf32>
    %194 = arith.mulf %192, %193 : vector<8x8xf32>
    %c0_159 = arith.constant 0 : index
    %c0_160 = arith.constant 0 : index
    %c0_161 = arith.constant 0 : index
    %195 = vector.load %arg1[%c0_159, %c0_160, %c0_161] : memref<4x8x8xf32, #tpu.memory_space<vmem>>, vector<1x8x8xf32>
    %196 = vector.shape_cast %195 : vector<1x8x8xf32> to vector<8x8xf32>
    %197 = arith.addf %194, %196 : vector<8x8xf32>
    %cst_162 = arith.constant dense<0xFF800000> : vector<8xf32>
    %198 = vector.multi_reduction <maximumf>, %197, %cst_162 [1] : vector<8x8xf32> to vector<8xf32>
    %199 = vector.shape_cast %198 : vector<8xf32> to vector<8x1xf32>
    %200 = vector.broadcast %199 : vector<8x1xf32> to vector<8x8xf32>
    %201 = arith.subf %197, %200 : vector<8x8xf32>
    %202 = math.exp %201 : vector<8x8xf32>
    %cst_163 = arith.constant dense<0.000000e+00> : vector<8xf32>
    %203 = vector.multi_reduction <add>, %202, %cst_163 [1] : vector<8x8xf32> to vector<8xf32>
    %204 = vector.shape_cast %203 : vector<8xf32> to vector<8x1xf32>
    %205 = tpu.reciprocal %204 {approx = true} : vector<8x1xf32> -> vector<8x1xf32>
    %206 = vector.broadcast %205 : vector<8x1xf32> to vector<8x8xf32>
    %207 = arith.mulf %202, %206 : vector<8x8xf32>
    %cst_164 = arith.constant dense<0.000000e+00> : vector<8x8xf32>
    %208 = tpu.matmul %207, %191, %cst_164 {dimension_numbers = #tpu.dot_dimension_numbers<[1], [0], [0], [1], [0, 0, 1, 1], [], []>} : vector<8x8xf32>, vector<8x8xf32>, vector<8x8xf32> -> vector<8x8xf32>
    %c1_165 = arith.constant 1 : index
    %c0_166 = arith.constant 0 : index
    %c0_167 = arith.constant 0 : index
    %c0_168 = arith.constant 0 : index
    %209 = vector.load %arg7[%c1_165, %c0_166, %c0_167, %c0_168] : memref<2x4x8x32xf32, #tpu.memory_space<vmem>>, vector<1x1x8x32xf32>
    %210 = vector.shape_cast %209 : vector<1x1x8x32xf32> to vector<8x32xf32>
    %cst_169 = arith.constant dense<0.000000e+00> : vector<8x32xf32>
    %211 = tpu.matmul %208, %210, %cst_169 {dimension_numbers = #tpu.dot_dimension_numbers<[1], [0], [0], [1], [0, 0, 1, 1], [], []>} : vector<8x8xf32>, vector<8x32xf32>, vector<8x32xf32> -> vector<8x32xf32>
    %212 = arith.addf %182, %211 : vector<8x32xf32>
    %c1_170 = arith.constant 1 : index
    %c1_171 = arith.constant 1 : index
    %c0_172 = arith.constant 0 : index
    %c0_173 = arith.constant 0 : index
    %213 = vector.load %arg4[%c1_170, %c1_171, %c0_172, %c0_173] : memref<2x4x32x8xf32, #tpu.memory_space<vmem>>, vector<1x1x32x8xf32>
    %214 = vector.shape_cast %213 : vector<1x1x32x8xf32> to vector<32x8xf32>
    %cst_174 = arith.constant dense<0.000000e+00> : vector<8x8xf32>
    %215 = tpu.matmul %181, %214, %cst_174 {dimension_numbers = #tpu.dot_dimension_numbers<[1], [0], [0], [1], [0, 0, 1, 1], [], []>} : vector<8x32xf32>, vector<32x8xf32>, vector<8x8xf32> -> vector<8x8xf32>
    %c1_175 = arith.constant 1 : index
    %c1_176 = arith.constant 1 : index
    %c0_177 = arith.constant 0 : index
    %c0_178 = arith.constant 0 : index
    %216 = vector.load %arg5[%c1_175, %c1_176, %c0_177, %c0_178] : memref<2x4x32x8xf32, #tpu.memory_space<vmem>>, vector<1x1x32x8xf32>
    %217 = vector.shape_cast %216 : vector<1x1x32x8xf32> to vector<32x8xf32>
    %cst_179 = arith.constant dense<0.000000e+00> : vector<8x8xf32>
    %218 = tpu.matmul %181, %217, %cst_179 {dimension_numbers = #tpu.dot_dimension_numbers<[1], [0], [0], [1], [0, 0, 1, 1], [], []>} : vector<8x32xf32>, vector<32x8xf32>, vector<8x8xf32> -> vector<8x8xf32>
    %c1_180 = arith.constant 1 : index
    %c1_181 = arith.constant 1 : index
    %c0_182 = arith.constant 0 : index
    %c0_183 = arith.constant 0 : index
    %219 = vector.load %arg6[%c1_180, %c1_181, %c0_182, %c0_183] : memref<2x4x32x8xf32, #tpu.memory_space<vmem>>, vector<1x1x32x8xf32>
    %220 = vector.shape_cast %219 : vector<1x1x32x8xf32> to vector<32x8xf32>
    %cst_184 = arith.constant dense<0.000000e+00> : vector<8x8xf32>
    %221 = tpu.matmul %181, %220, %cst_184 {dimension_numbers = #tpu.dot_dimension_numbers<[1], [0], [0], [1], [0, 0, 1, 1], [], []>} : vector<8x32xf32>, vector<32x8xf32>, vector<8x8xf32> -> vector<8x8xf32>
    %cst_185 = arith.constant dense<0.000000e+00> : vector<8x8xf32>
    %222 = tpu.matmul %215, %218, %cst_185 {dimension_numbers = #tpu.dot_dimension_numbers<[1], [1], [0], [0], [0, 0, 1, 0], [], []>} : vector<8x8xf32>, vector<8x8xf32>, vector<8x8xf32> -> vector<8x8xf32>
    %cst_186 = arith.constant 0.353553385 : f32
    %223 = vector.broadcast %cst_186 : f32 to vector<8x8xf32>
    %224 = arith.mulf %222, %223 : vector<8x8xf32>
    %c1_187 = arith.constant 1 : index
    %c0_188 = arith.constant 0 : index
    %c0_189 = arith.constant 0 : index
    %225 = vector.load %arg1[%c1_187, %c0_188, %c0_189] : memref<4x8x8xf32, #tpu.memory_space<vmem>>, vector<1x8x8xf32>
    %226 = vector.shape_cast %225 : vector<1x8x8xf32> to vector<8x8xf32>
    %227 = arith.addf %224, %226 : vector<8x8xf32>
    %cst_190 = arith.constant dense<0xFF800000> : vector<8xf32>
    %228 = vector.multi_reduction <maximumf>, %227, %cst_190 [1] : vector<8x8xf32> to vector<8xf32>
    %229 = vector.shape_cast %228 : vector<8xf32> to vector<8x1xf32>
    %230 = vector.broadcast %229 : vector<8x1xf32> to vector<8x8xf32>
    %231 = arith.subf %227, %230 : vector<8x8xf32>
    %232 = math.exp %231 : vector<8x8xf32>
    %cst_191 = arith.constant dense<0.000000e+00> : vector<8xf32>
    %233 = vector.multi_reduction <add>, %232, %cst_191 [1] : vector<8x8xf32> to vector<8xf32>
    %234 = vector.shape_cast %233 : vector<8xf32> to vector<8x1xf32>
    %235 = tpu.reciprocal %234 {approx = true} : vector<8x1xf32> -> vector<8x1xf32>
    %236 = vector.broadcast %235 : vector<8x1xf32> to vector<8x8xf32>
    %237 = arith.mulf %232, %236 : vector<8x8xf32>
    %cst_192 = arith.constant dense<0.000000e+00> : vector<8x8xf32>
    %238 = tpu.matmul %237, %221, %cst_192 {dimension_numbers = #tpu.dot_dimension_numbers<[1], [0], [0], [1], [0, 0, 1, 1], [], []>} : vector<8x8xf32>, vector<8x8xf32>, vector<8x8xf32> -> vector<8x8xf32>
    %c1_193 = arith.constant 1 : index
    %c1_194 = arith.constant 1 : index
    %c0_195 = arith.constant 0 : index
    %c0_196 = arith.constant 0 : index
    %239 = vector.load %arg7[%c1_193, %c1_194, %c0_195, %c0_196] : memref<2x4x8x32xf32, #tpu.memory_space<vmem>>, vector<1x1x8x32xf32>
    %240 = vector.shape_cast %239 : vector<1x1x8x32xf32> to vector<8x32xf32>
    %cst_197 = arith.constant dense<0.000000e+00> : vector<8x32xf32>
    %241 = tpu.matmul %238, %240, %cst_197 {dimension_numbers = #tpu.dot_dimension_numbers<[1], [0], [0], [1], [0, 0, 1, 1], [], []>} : vector<8x8xf32>, vector<8x32xf32>, vector<8x32xf32> -> vector<8x32xf32>
    %242 = arith.addf %212, %241 : vector<8x32xf32>
    %c1_198 = arith.constant 1 : index
    %c2_199 = arith.constant 2 : index
    %c0_200 = arith.constant 0 : index
    %c0_201 = arith.constant 0 : index
    %243 = vector.load %arg4[%c1_198, %c2_199, %c0_200, %c0_201] : memref<2x4x32x8xf32, #tpu.memory_space<vmem>>, vector<1x1x32x8xf32>
    %244 = vector.shape_cast %243 : vector<1x1x32x8xf32> to vector<32x8xf32>
    %cst_202 = arith.constant dense<0.000000e+00> : vector<8x8xf32>
    %245 = tpu.matmul %181, %244, %cst_202 {dimension_numbers = #tpu.dot_dimension_numbers<[1], [0], [0], [1], [0, 0, 1, 1], [], []>} : vector<8x32xf32>, vector<32x8xf32>, vector<8x8xf32> -> vector<8x8xf32>
    %c1_203 = arith.constant 1 : index
    %c2_204 = arith.constant 2 : index
    %c0_205 = arith.constant 0 : index
    %c0_206 = arith.constant 0 : index
    %246 = vector.load %arg5[%c1_203, %c2_204, %c0_205, %c0_206] : memref<2x4x32x8xf32, #tpu.memory_space<vmem>>, vector<1x1x32x8xf32>
    %247 = vector.shape_cast %246 : vector<1x1x32x8xf32> to vector<32x8xf32>
    %cst_207 = arith.constant dense<0.000000e+00> : vector<8x8xf32>
    %248 = tpu.matmul %181, %247, %cst_207 {dimension_numbers = #tpu.dot_dimension_numbers<[1], [0], [0], [1], [0, 0, 1, 1], [], []>} : vector<8x32xf32>, vector<32x8xf32>, vector<8x8xf32> -> vector<8x8xf32>
    %c1_208 = arith.constant 1 : index
    %c2_209 = arith.constant 2 : index
    %c0_210 = arith.constant 0 : index
    %c0_211 = arith.constant 0 : index
    %249 = vector.load %arg6[%c1_208, %c2_209, %c0_210, %c0_211] : memref<2x4x32x8xf32, #tpu.memory_space<vmem>>, vector<1x1x32x8xf32>
    %250 = vector.shape_cast %249 : vector<1x1x32x8xf32> to vector<32x8xf32>
    %cst_212 = arith.constant dense<0.000000e+00> : vector<8x8xf32>
    %251 = tpu.matmul %181, %250, %cst_212 {dimension_numbers = #tpu.dot_dimension_numbers<[1], [0], [0], [1], [0, 0, 1, 1], [], []>} : vector<8x32xf32>, vector<32x8xf32>, vector<8x8xf32> -> vector<8x8xf32>
    %cst_213 = arith.constant dense<0.000000e+00> : vector<8x8xf32>
    %252 = tpu.matmul %245, %248, %cst_213 {dimension_numbers = #tpu.dot_dimension_numbers<[1], [1], [0], [0], [0, 0, 1, 0], [], []>} : vector<8x8xf32>, vector<8x8xf32>, vector<8x8xf32> -> vector<8x8xf32>
    %cst_214 = arith.constant 0.353553385 : f32
    %253 = vector.broadcast %cst_214 : f32 to vector<8x8xf32>
    %254 = arith.mulf %252, %253 : vector<8x8xf32>
    %c2_215 = arith.constant 2 : index
    %c0_216 = arith.constant 0 : index
    %c0_217 = arith.constant 0 : index
    %255 = vector.load %arg1[%c2_215, %c0_216, %c0_217] : memref<4x8x8xf32, #tpu.memory_space<vmem>>, vector<1x8x8xf32>
    %256 = vector.shape_cast %255 : vector<1x8x8xf32> to vector<8x8xf32>
    %257 = arith.addf %254, %256 : vector<8x8xf32>
    %cst_218 = arith.constant dense<0xFF800000> : vector<8xf32>
    %258 = vector.multi_reduction <maximumf>, %257, %cst_218 [1] : vector<8x8xf32> to vector<8xf32>
    %259 = vector.shape_cast %258 : vector<8xf32> to vector<8x1xf32>
    %260 = vector.broadcast %259 : vector<8x1xf32> to vector<8x8xf32>
    %261 = arith.subf %257, %260 : vector<8x8xf32>
    %262 = math.exp %261 : vector<8x8xf32>
    %cst_219 = arith.constant dense<0.000000e+00> : vector<8xf32>
    %263 = vector.multi_reduction <add>, %262, %cst_219 [1] : vector<8x8xf32> to vector<8xf32>
    %264 = vector.shape_cast %263 : vector<8xf32> to vector<8x1xf32>
    %265 = tpu.reciprocal %264 {approx = true} : vector<8x1xf32> -> vector<8x1xf32>
    %266 = vector.broadcast %265 : vector<8x1xf32> to vector<8x8xf32>
    %267 = arith.mulf %262, %266 : vector<8x8xf32>
    %cst_220 = arith.constant dense<0.000000e+00> : vector<8x8xf32>
    %268 = tpu.matmul %267, %251, %cst_220 {dimension_numbers = #tpu.dot_dimension_numbers<[1], [0], [0], [1], [0, 0, 1, 1], [], []>} : vector<8x8xf32>, vector<8x8xf32>, vector<8x8xf32> -> vector<8x8xf32>
    %c1_221 = arith.constant 1 : index
    %c2_222 = arith.constant 2 : index
    %c0_223 = arith.constant 0 : index
    %c0_224 = arith.constant 0 : index
    %269 = vector.load %arg7[%c1_221, %c2_222, %c0_223, %c0_224] : memref<2x4x8x32xf32, #tpu.memory_space<vmem>>, vector<1x1x8x32xf32>
    %270 = vector.shape_cast %269 : vector<1x1x8x32xf32> to vector<8x32xf32>
    %cst_225 = arith.constant dense<0.000000e+00> : vector<8x32xf32>
    %271 = tpu.matmul %268, %270, %cst_225 {dimension_numbers = #tpu.dot_dimension_numbers<[1], [0], [0], [1], [0, 0, 1, 1], [], []>} : vector<8x8xf32>, vector<8x32xf32>, vector<8x32xf32> -> vector<8x32xf32>
    %272 = arith.addf %242, %271 : vector<8x32xf32>
    %c1_226 = arith.constant 1 : index
    %c3_227 = arith.constant 3 : index
    %c0_228 = arith.constant 0 : index
    %c0_229 = arith.constant 0 : index
    %273 = vector.load %arg4[%c1_226, %c3_227, %c0_228, %c0_229] : memref<2x4x32x8xf32, #tpu.memory_space<vmem>>, vector<1x1x32x8xf32>
    %274 = vector.shape_cast %273 : vector<1x1x32x8xf32> to vector<32x8xf32>
    %cst_230 = arith.constant dense<0.000000e+00> : vector<8x8xf32>
    %275 = tpu.matmul %181, %274, %cst_230 {dimension_numbers = #tpu.dot_dimension_numbers<[1], [0], [0], [1], [0, 0, 1, 1], [], []>} : vector<8x32xf32>, vector<32x8xf32>, vector<8x8xf32> -> vector<8x8xf32>
    %c1_231 = arith.constant 1 : index
    %c3_232 = arith.constant 3 : index
    %c0_233 = arith.constant 0 : index
    %c0_234 = arith.constant 0 : index
    %276 = vector.load %arg5[%c1_231, %c3_232, %c0_233, %c0_234] : memref<2x4x32x8xf32, #tpu.memory_space<vmem>>, vector<1x1x32x8xf32>
    %277 = vector.shape_cast %276 : vector<1x1x32x8xf32> to vector<32x8xf32>
    %cst_235 = arith.constant dense<0.000000e+00> : vector<8x8xf32>
    %278 = tpu.matmul %181, %277, %cst_235 {dimension_numbers = #tpu.dot_dimension_numbers<[1], [0], [0], [1], [0, 0, 1, 1], [], []>} : vector<8x32xf32>, vector<32x8xf32>, vector<8x8xf32> -> vector<8x8xf32>
    %c1_236 = arith.constant 1 : index
    %c3_237 = arith.constant 3 : index
    %c0_238 = arith.constant 0 : index
    %c0_239 = arith.constant 0 : index
    %279 = vector.load %arg6[%c1_236, %c3_237, %c0_238, %c0_239] : memref<2x4x32x8xf32, #tpu.memory_space<vmem>>, vector<1x1x32x8xf32>
    %280 = vector.shape_cast %279 : vector<1x1x32x8xf32> to vector<32x8xf32>
    %cst_240 = arith.constant dense<0.000000e+00> : vector<8x8xf32>
    %281 = tpu.matmul %181, %280, %cst_240 {dimension_numbers = #tpu.dot_dimension_numbers<[1], [0], [0], [1], [0, 0, 1, 1], [], []>} : vector<8x32xf32>, vector<32x8xf32>, vector<8x8xf32> -> vector<8x8xf32>
    %cst_241 = arith.constant dense<0.000000e+00> : vector<8x8xf32>
    %282 = tpu.matmul %275, %278, %cst_241 {dimension_numbers = #tpu.dot_dimension_numbers<[1], [1], [0], [0], [0, 0, 1, 0], [], []>} : vector<8x8xf32>, vector<8x8xf32>, vector<8x8xf32> -> vector<8x8xf32>
    %cst_242 = arith.constant 0.353553385 : f32
    %283 = vector.broadcast %cst_242 : f32 to vector<8x8xf32>
    %284 = arith.mulf %282, %283 : vector<8x8xf32>
    %c3_243 = arith.constant 3 : index
    %c0_244 = arith.constant 0 : index
    %c0_245 = arith.constant 0 : index
    %285 = vector.load %arg1[%c3_243, %c0_244, %c0_245] : memref<4x8x8xf32, #tpu.memory_space<vmem>>, vector<1x8x8xf32>
    %286 = vector.shape_cast %285 : vector<1x8x8xf32> to vector<8x8xf32>
    %287 = arith.addf %284, %286 : vector<8x8xf32>
    %cst_246 = arith.constant dense<0xFF800000> : vector<8xf32>
    %288 = vector.multi_reduction <maximumf>, %287, %cst_246 [1] : vector<8x8xf32> to vector<8xf32>
    %289 = vector.shape_cast %288 : vector<8xf32> to vector<8x1xf32>
    %290 = vector.broadcast %289 : vector<8x1xf32> to vector<8x8xf32>
    %291 = arith.subf %287, %290 : vector<8x8xf32>
    %292 = math.exp %291 : vector<8x8xf32>
    %cst_247 = arith.constant dense<0.000000e+00> : vector<8xf32>
    %293 = vector.multi_reduction <add>, %292, %cst_247 [1] : vector<8x8xf32> to vector<8xf32>
    %294 = vector.shape_cast %293 : vector<8xf32> to vector<8x1xf32>
    %295 = tpu.reciprocal %294 {approx = true} : vector<8x1xf32> -> vector<8x1xf32>
    %296 = vector.broadcast %295 : vector<8x1xf32> to vector<8x8xf32>
    %297 = arith.mulf %292, %296 : vector<8x8xf32>
    %cst_248 = arith.constant dense<0.000000e+00> : vector<8x8xf32>
    %298 = tpu.matmul %297, %281, %cst_248 {dimension_numbers = #tpu.dot_dimension_numbers<[1], [0], [0], [1], [0, 0, 1, 1], [], []>} : vector<8x8xf32>, vector<8x8xf32>, vector<8x8xf32> -> vector<8x8xf32>
    %c1_249 = arith.constant 1 : index
    %c3_250 = arith.constant 3 : index
    %c0_251 = arith.constant 0 : index
    %c0_252 = arith.constant 0 : index
    %299 = vector.load %arg7[%c1_249, %c3_250, %c0_251, %c0_252] : memref<2x4x8x32xf32, #tpu.memory_space<vmem>>, vector<1x1x8x32xf32>
    %300 = vector.shape_cast %299 : vector<1x1x8x32xf32> to vector<8x32xf32>
    %cst_253 = arith.constant dense<0.000000e+00> : vector<8x32xf32>
    %301 = tpu.matmul %298, %300, %cst_253 {dimension_numbers = #tpu.dot_dimension_numbers<[1], [0], [0], [1], [0, 0, 1, 1], [], []>} : vector<8x8xf32>, vector<8x32xf32>, vector<8x32xf32> -> vector<8x32xf32>
    %302 = arith.addf %272, %301 : vector<8x32xf32>
    %303 = arith.addf %167, %302 : vector<8x32xf32>
    %c1_254 = arith.constant 1 : index
    %c0_255 = arith.constant 0 : index
    %c0_256 = arith.constant 0 : index
    %304 = vector.load %arg3[%c1_254, %c0_255, %c0_256] : memref<2x1x32xf32, #tpu.memory_space<vmem>>, vector<1x1x32xf32>
    %305 = vector.shape_cast %304 : vector<1x1x32xf32> to vector<1x32xf32>
    %306 = arith.mulf %303, %303 : vector<8x32xf32>
    %cst_257 = arith.constant dense<0.000000e+00> : vector<8xf32>
    %307 = vector.multi_reduction <add>, %306, %cst_257 [1] : vector<8x32xf32> to vector<8xf32>
    %308 = vector.shape_cast %307 : vector<8xf32> to vector<8x1xf32>
    %cst_258 = arith.constant 3.200000e+01 : f32
    %309 = vector.broadcast %cst_258 : f32 to vector<8x1xf32>
    %310 = arith.divf %308, %309 : vector<8x1xf32>
    %cst_259 = arith.constant 9.99999997E-7 : f32
    %311 = vector.broadcast %cst_259 : f32 to vector<8x1xf32>
    %312 = arith.addf %310, %311 : vector<8x1xf32>
    %313 = math.rsqrt %312 : vector<8x1xf32>
    %314 = vector.broadcast %313 : vector<8x1xf32> to vector<8x32xf32>
    %315 = arith.mulf %303, %314 : vector<8x32xf32>
    %316 = vector.broadcast %305 : vector<1x32xf32> to vector<8x32xf32>
    %317 = arith.mulf %315, %316 : vector<8x32xf32>
    %c1_260 = arith.constant 1 : index
    %c0_261 = arith.constant 0 : index
    %c0_262 = arith.constant 0 : index
    %318 = vector.load %arg8[%c1_260, %c0_261, %c0_262] : memref<2x32x64xf32, #tpu.memory_space<vmem>>, vector<1x32x64xf32>
    %319 = vector.shape_cast %318 : vector<1x32x64xf32> to vector<32x64xf32>
    %cst_263 = arith.constant dense<0.000000e+00> : vector<8x64xf32>
    %320 = tpu.matmul %317, %319, %cst_263 {dimension_numbers = #tpu.dot_dimension_numbers<[1], [0], [0], [1], [0, 0, 1, 1], [], []>} : vector<8x32xf32>, vector<32x64xf32>, vector<8x64xf32> -> vector<8x64xf32>
    %c1_264 = arith.constant 1 : index
    %c0_265 = arith.constant 0 : index
    %c0_266 = arith.constant 0 : index
    %321 = vector.load %arg9[%c1_264, %c0_265, %c0_266] : memref<2x32x64xf32, #tpu.memory_space<vmem>>, vector<1x32x64xf32>
    %322 = vector.shape_cast %321 : vector<1x32x64xf32> to vector<32x64xf32>
    %cst_267 = arith.constant dense<0.000000e+00> : vector<8x64xf32>
    %323 = tpu.matmul %317, %322, %cst_267 {dimension_numbers = #tpu.dot_dimension_numbers<[1], [0], [0], [1], [0, 0, 1, 1], [], []>} : vector<8x32xf32>, vector<32x64xf32>, vector<8x64xf32> -> vector<8x64xf32>
    %324 = arith.negf %320 : vector<8x64xf32>
    %325 = math.exp %324 : vector<8x64xf32>
    %cst_268 = arith.constant 1.000000e+00 : f32
    %326 = vector.broadcast %cst_268 : f32 to vector<8x64xf32>
    %327 = arith.addf %326, %325 : vector<8x64xf32>
    %328 = arith.divf %326, %327 : vector<8x64xf32>
    %329 = arith.mulf %320, %328 : vector<8x64xf32>
    %330 = arith.mulf %329, %323 : vector<8x64xf32>
    %c1_269 = arith.constant 1 : index
    %c0_270 = arith.constant 0 : index
    %c0_271 = arith.constant 0 : index
    %331 = vector.load %arg10[%c1_269, %c0_270, %c0_271] : memref<2x64x32xf32, #tpu.memory_space<vmem>>, vector<1x64x32xf32>
    %332 = vector.shape_cast %331 : vector<1x64x32xf32> to vector<64x32xf32>
    %cst_272 = arith.constant dense<0.000000e+00> : vector<8x32xf32>
    %333 = tpu.matmul %330, %332, %cst_272 {dimension_numbers = #tpu.dot_dimension_numbers<[1], [0], [0], [1], [0, 0, 1, 1], [], []>} : vector<8x64xf32>, vector<64x32xf32>, vector<8x32xf32> -> vector<8x32xf32>
    %334 = arith.addf %303, %333 : vector<8x32xf32>
    %c0_273 = arith.constant 0 : index
    %c0_274 = arith.constant 0 : index
    %335 = vector.load %arg11[%c0_273, %c0_274] : memref<1x32xf32, #tpu.memory_space<vmem>>, vector<1x32xf32>
    %336 = arith.mulf %334, %334 : vector<8x32xf32>
    %cst_275 = arith.constant dense<0.000000e+00> : vector<8xf32>
    %337 = vector.multi_reduction <add>, %336, %cst_275 [1] : vector<8x32xf32> to vector<8xf32>
    %338 = vector.shape_cast %337 : vector<8xf32> to vector<8x1xf32>
    %cst_276 = arith.constant 3.200000e+01 : f32
    %339 = vector.broadcast %cst_276 : f32 to vector<8x1xf32>
    %340 = arith.divf %338, %339 : vector<8x1xf32>
    %cst_277 = arith.constant 9.99999997E-7 : f32
    %341 = vector.broadcast %cst_277 : f32 to vector<8x1xf32>
    %342 = arith.addf %340, %341 : vector<8x1xf32>
    %343 = math.rsqrt %342 : vector<8x1xf32>
    %344 = vector.broadcast %343 : vector<8x1xf32> to vector<8x32xf32>
    %345 = arith.mulf %334, %344 : vector<8x32xf32>
    %346 = vector.broadcast %335 : vector<1x32xf32> to vector<8x32xf32>
    %347 = arith.mulf %345, %346 : vector<8x32xf32>
    %c0_278 = arith.constant 0 : index
    %c0_279 = arith.constant 0 : index
    %348 = vector.load %arg12[%c0_278, %c0_279] : memref<32x256xf32, #tpu.memory_space<vmem>>, vector<32x256xf32>
    %cst_280 = arith.constant dense<0.000000e+00> : vector<8x256xf32>
    %349 = tpu.matmul %347, %348, %cst_280 {dimension_numbers = #tpu.dot_dimension_numbers<[1], [0], [0], [1], [0, 0, 1, 1], [], []>} : vector<8x32xf32>, vector<32x256xf32>, vector<8x256xf32> -> vector<8x256xf32>
    %c0_281 = arith.constant 0 : index
    %c0_282 = arith.constant 0 : index
    %350 = vector.load %arg13[%c0_281, %c0_282] : memref<8x256xf32, #tpu.memory_space<vmem>>, vector<8x256xf32>
    tpu.vector_store %arg13[%c0_281, %c0_282], %349 {strides = array<i32>} : memref<8x256xf32, #tpu.memory_space<vmem>>, vector<8x256xf32>,
    return
  }
}

</mosaic_0001>

<bundles_post_ra>
// kernel: baichuan_forward.1
= control target key start
LH: loop header
LB: loop body
LE: loop exit
PB: predicated region body
PF: predicated region fallthrough
CT: control target
= control target key end

     0   :  { %vm47_vm0 = vcmask 261120   ;;  %v1982_v3 = vmov 32.0   ;;  %vm150_vm5 = vcmask 64512   ;;  %vm835_vm13 = vcmask 523264   ;;  %s2681_s0 = inlined_call_operand.vmem [shape: f32[8,32], index: 0, kind: input, shape index: {}]   ;;  %s2682_s2 = inlined_call_operand.vmem [shape: f32[2,1,32], index: 2, kind: input, shape index: {}]   ;;  %s2683_s4 = inlined_call_operand.vmem [shape: f32[2,4,32,8], index: 4, kind: input, shape index: {}]   ;;  %s2684_s5 = inlined_call_operand.vmem [shape: f32[2,4,32,8], index: 5, kind: input, shape index: {}]   ;;  %s2685_s6 = inlined_call_operand.vmem [shape: f32[2,4,32,8], index: 6, kind: input, shape index: {}]   ;;  %s2686_s1 = inlined_call_operand.vmem [shape: f32[4,8,8], index: 1, kind: input, shape index: {}]   ;;  %s2687_s7 = inlined_call_operand.vmem [shape: f32[2,4,8,32], index: 7, kind: input, shape index: {}]   ;;  %s2688_s3 = inlined_call_operand.vmem [shape: f32[2,1,32], index: 3, kind: input, shape index: {}]   ;;  %s2689_s8 = inlined_call_operand.vmem [shape: f32[2,32,64], index: 8, kind: input, shape index: {}]   ;;  %s2690_s9 = inlined_call_operand.vmem [shape: f32[2,32,64], index: 9, kind: input, shape index: {}]   ;;  %s2691_s10 = inlined_call_operand.vmem [shape: f32[2,64,32], index: 10, kind: input, shape index: {}]   ;;  %s2692_s11 = inlined_call_operand.vmem [shape: f32[1,32], index: 11, kind: input, shape index: {}]   ;;  %s2693_s12 = inlined_call_operand.vmem [shape: f32[32,256], index: 12, kind: input, shape index: {}]   ;;  %s2694_s13 = inlined_call_operand.vmem [shape: f32[8,256], index: 13, kind: output, shape index: {}]  }
   0x1   :  { %v2056_v0 = vld [vmem:[%s2681_s0] sm:$0xff]  ;;  %1930 = vrcp.f32 %v1982_v3  ;;  %v78_v7 = vld [vmem:[%s2683_s4 + $0x18] sm:$0xff]  ;;  %v77_v10 = vld [vmem:[%s2683_s4 + $0x10] sm:$0xff] }
   0x2   :  { %v46_v1 = vmul.f32 %v2056_v0, %v2056_v0  ;;  %v105_v8 = vld [vmem:[%s2684_s5 + $0x18] sm:$0xff]  ;;  %94 = vmatpush.msra.mxu0 %v78_v7  ;;  %v104_v11 = vld [vmem:[%s2684_s5 + $0x10] sm:$0xff]  ;;  %v76_v14 = vld [vmem:[%s2683_s4 + $0x8] sm:$0xff] }
   0x3   :  { %v129_v9 = vld [vmem:[%s2685_s6 + $0x18] sm:$0xff]  ;;  %118 = vmatpush.msra.mxu1 %v105_v8  ;;  %v128_v12 = vld [vmem:[%s2685_s6 + $0x10] sm:$0xff]  ;;  %v103_v15 = vld [vmem:[%s2684_s5 + $0x8] sm:$0xff] }
   0x4   :  { %v48_v2 = vsel %vm47_vm0, %v46_v1, 0.0  ;;  %142 = vmatpush.msra.mxu2 %v129_v9  ;;  %95 = vmatpush.msra.mxu0 %v77_v10  ;;  %v127_v16 = vld [vmem:[%s2685_s6 + $0x8] sm:$0xff]  ;;  %v75_v17 = vld [vmem:[%s2683_s4] sm:$0xff]  ;;  %v1755_v21 = vld [vmem:[%s2683_s4 + $0x38] sm:$0xff] }
   0x5   :  { %49 = vadd.xlane.f32.xlu0 %v48_v2  ;;  %119 = vmatpush.msra.mxu1 %v104_v11  ;;  %v102_v18 = vld [vmem:[%s2684_s5] sm:$0xff]  ;;  %v1760_v22 = vld [vmem:[%s2684_s5 + $0x38] sm:$0xff]  ;;  %v1754_v24 = vld [vmem:[%s2683_s4 + $0x30] sm:$0xff] }
   0x6   :  { %143 = vmatpush.msra.mxu2 %v128_v12  ;;  %96 = vmatpush.msra.mxu0 %v76_v14  ;;  %v126_v19 = vld [vmem:[%s2685_s6] sm:$0xff]  ;;  %v1765_v23 = vld [vmem:[%s2685_s6 + $0x38] sm:$0xff]  ;;  %v1759_v25 = vld [vmem:[%s2684_s5 + $0x30] sm:$0xff] }
   0x7   :  { %v1931_v4 = vpop.eup %1930  ;;  %120 = vmatpush.msra.mxu1 %v103_v15  ;;  %v1764_v26 = vld [vmem:[%s2685_s6 + $0x30] sm:$0xff]  ;;  %v1753_v28 = vld [vmem:[%s2683_s4 + $0x28] sm:$0xff]  ;;  %v1752_v32 = vld [vmem:[%s2683_s4 + $0x20] sm:$0xff] }
   0x8   :  { %v52_v5 = vmul.f32 32.0, %v1931_v4  ;;  %144 = vmatpush.msra.mxu2 %v127_v16  ;;  %97 = vmatpush.msra.mxu0 %v75_v17  ;;  %vm56_vm1 = vweird.f32 %v1931_v4  ;;  %v1758_v29 = vld [vmem:[%s2684_s5 + $0x28] sm:$0xff]  ;;  %v1757_v33 = vld [vmem:[%s2684_s5 + $0x20] sm:$0xff]  ;;  %v1777_v2 = vld [vmem:[%s2683_s4 + $0x58] sm:$0xff] }
   0x9   :  { %121 = vmatpush.msra.mxu1 %v102_v18  ;;  %v1763_v30 = vld [vmem:[%s2685_s6 + $0x28] sm:$0xff]  ;;  %v1762_v35 = vld [vmem:[%s2685_s6 + $0x20] sm:$0xff]  ;;  %v1776_v3 = vld [vmem:[%s2683_s4 + $0x50] sm:$0xff] }
   0xa   :  { %v53_v6 = vsub.f32 1.0, %v52_v5  ;;  %145 = vmatpush.msra.mxu2 %v126_v19  ;;  %232 = vmatpush.msrb.mxu0 %v1755_v21  ;;  %v1925_v43 = vld [vmem:[%s2682_s2] ss:$0 sm:$0xff]  ;;  %v2188_v10 = vld [vmem:[%s2686_s1 + $0x8] sm:$0xff]  ;;  %v1782_v19 = vld [vmem:[%s2684_s5 + $0x58] sm:$0xff] }
   0xb   :  { %257 = vmatpush.msrb.mxu1 %v1760_v22  ;;  %v2160_v53 = vld [vmem:[%s2686_s1] sm:$0xff]  ;;  %v1780_v21 = vld [vmem:[%s2684_s5 + $0x48] sm:$0xff] }
   0xc   :  { %v54_v13 = vmul.f32 %v1931_v4, %v53_v6  ;;  %282 = vmatpush.msrb.mxu2 %v1765_v23  ;;  %233 = vmatpush.msrb.mxu0 %v1754_v24  ;;  %v1774_v5 = vld [vmem:[%s2683_s4 + $0x40] sm:$0xff] }
   0xd   :  { %258 = vmatpush.msrb.mxu1 %v1759_v25  ;;  %v214_v7 = vld [vmem:[%s2687_s7] sm:$0xff] }
   0xe   :  { %v55_v20 = vadd.f32 %v1931_v4, %v54_v13  ;;  %283 = vmatpush.msrb.mxu2 %v1764_v26  ;;  %234 = vmatpush.msrb.mxu0 %v1753_v28  ;;  %v1779_v22 = vld [vmem:[%s2684_s5 + $0x40] sm:$0xff]  ;;  %v1771_v26 = vld [vmem:[%s2687_s7 + $0x8] sm:$0xff]  ;;  %v1787_v28 = vld [vmem:[%s2685_s6 + $0x58] sm:$0xff] }
   0xf   :  { %259 = vmatpush.msrb.mxu1 %v1758_v29  ;;  %v1786_v29 = vld [vmem:[%s2685_s6 + $0x50] sm:$0xff] }
  0x10   :  { %v2115_v27 = vsel %vm56_vm1, %v1931_v4, %v55_v20  ;;  %284 = vmatpush.msrb.mxu2 %v1763_v30  ;;  %235 = vmatpush.msrb.mxu0 %v1752_v32  ;;  %v1775_v4 = vld [vmem:[%s2683_s4 + $0x48] sm:$0xff]  ;;  %v1781_v20 = vld [vmem:[%s2684_s5 + $0x50] sm:$0xff]  ;;  %v1798_v32 = vld [vmem:[%s2683_s4 + $0x78] sm:$0xff] }
  0x11   :  { %260 = vmatpush.msrb.mxu1 %v1757_v33  ;;  %v1785_v30 = vld [vmem:[%s2685_s6 + $0x48] sm:$0xff] }
  0x12   :  { %285 = vmatpush.msrb.mxu2 %v1762_v35  ;;  %v1796_v35 = vld [vmem:[%s2683_s4 + $0x68] sm:$0xff] }
  0x78   :  { %v50_v31 = vpop.xlane.xlu0 %49 }
  0x79   :  { %v58_v34 = vmul.f32 %v2115_v27, %v50_v31  ;;  %v1784_v31 = vld [vmem:[%s2685_s6 + $0x40] sm:$0xff] }
  0x7b   :  { %v59_v36 = vadd.f32 1e-06, %v58_v34  ;;  %v1797_v34 = vld [vmem:[%s2683_s4 + $0x70] sm:$0xff] }
  0x7d   :  { %1932 = vrsqrt.f32 %v59_v36  ;;  %vm66_vm3 = vweird.f32 %v59_v36 }
  0x83   :  { %v1933_v37 = vpop.eup %1932 }
  0x84   :  { %v61_v38 = vmul.f32 %v1933_v37, %v59_v36  ;;  %vm67_vm2 = vweird.f32 %v1933_v37  ;;  %v1795_v36 = vld [vmem:[%s2683_s4 + $0x60] sm:$0xff] }
  0x85   :  { %vm68_vm4 = vmor %vm66_vm3, %vm67_vm2 }
  0x86   :  { %v62_v39 = vmul.f32 %v1933_v37, %v61_v38 }
  0x88   :  { %v63_v40 = vmul.f32 0.5, %v62_v39  ;;  %v1802_v39 = vld [vmem:[%s2684_s5 + $0x70] sm:$0xff] }
  0x8a   :  { %v64_v41 = vsub.f32 1.5, %v63_v40 }
  0x8c   :  { %v65_v42 = vmul.f32 %v1933_v37, %v64_v41  ;;  %v1801_v41 = vld [vmem:[%s2684_s5 + $0x68] sm:$0xff] }
  0x8e   :  { %v69_v44 = vsel %vm68_vm4, %v1933_v37, %v65_v42  ;;  %v1803_v37 = vld [vmem:[%s2684_s5 + $0x78] sm:$0xff]  ;;  %v1800_v42 = vld [vmem:[%s2684_s5 + $0x60] sm:$0xff] }
  0x8f   :  { %v70_v45 = vmul.f32 %v69_v44, %v2056_v0 }
  0x91   :  { %v2140_v46 = vmul.f32 %v1925_v43, %v70_v45  ;;  %v1793_v43 = vld [vmem:[%s2687_s7 + $0x10] sm:$0xff] }
  0x93   :  { %1746 = vmatmul.msk.f32.vlgmr.msra.gmra.mxu0 %vm47_vm0, %v2140_v46  ;;  %1747 = vmatmul.msk.f32.vlgmr.msra.gmra.mxu1 %vm47_vm0, %v2140_v46 }
  0x94   :  { %1748 = vmatmul.msk.f32.vlgmr.msra.gmra.mxu2 %vm47_vm0, %v2140_v46  ;;  %374 = vmatpush.msra.mxu1 %v1771_v26 }
  0x95   :  { %397 = vmatpush.msra.mxu2 %v214_v7 }
  0x9b   :  { %1756 = vmatmul.msk.f32.vlgmr.msrb.gmra.mxu0 %vm47_vm0, %v2140_v46  ;;  %1761 = vmatmul.msk.f32.vlgmr.msrb.gmra.mxu1 %vm47_vm0, %v2140_v46 }
  0x9c   :  { %1766 = vmatmul.msk.f32.vlgmr.msrb.gmra.mxu2 %vm47_vm0, %v2140_v46  ;;  %469 = vmatpush.msrb.mxu1 %v1787_v28 }
  0x9e   :  { %470 = vmatpush.msrb.mxu1 %v1786_v29 }
  0xa0   :  { %471 = vmatpush.msrb.mxu1 %v1785_v30 }
  0xa2   :  { %472 = vmatpush.msrb.mxu1 %v1784_v31  ;;  %v758_v31 = vld [vmem:[%s2689_s8 + $0x18] sm:$0xff] }
 0x110   :  { %v123_v47 = vpop.f32.mrf.mxu1  ;;  %v99_v48 = vpop.f32.mrf.mxu0 }
 0x111   :  { %1749 = vmatpush.xpose.msk.msra.mxu3 %vm150_vm5, %v123_v47 }
 0x114   :  { %1750 = vmatmul.msk.f32.vlgmr.msra.gmra.mxu3 %vm150_vm5, %v99_v48 }
 0x117   :  { %v147_v49 = vpop.f32.mrf.mxu2 }
 0x118   :  { %209 = vmatpush.msrb.mxu3 %v147_v49  ;;  %v262_v50 = vpop.f32.mrf.mxu1  ;;  %v237_v6 = vpop.f32.mrf.mxu0 }
 0x11a   :  { %1767 = vmatpush.xpose.msk.msra.mxu3 %vm150_vm5, %v262_v50  ;;  %v2262_v50 = vld [vmem:[%s2686_s1 + $0x10] sm:$0xff] }
 0x11f   :  { %v287_v51 = vpop.f32.mrf.mxu2 }
 0x120   :  { %349 = vmatpush.msra.mxu0 %v287_v51 }
 0x122   :  { %444 = vmatpush.msrb.mxu0 %v1782_v19 }
 0x124   :  { %445 = vmatpush.msrb.mxu0 %v1781_v20  ;;  %v1814_v20 = vld [vmem:[%s2687_s7 + $0x18] sm:$0xff] }
 0x126   :  { %446 = vmatpush.msrb.mxu0 %v1780_v21 }
 0x128   :  { %447 = vmatpush.msrb.mxu0 %v1779_v22 }
 0x197   :  { %v174_v52 = vpop.f32.mrf.mxu3 }
 0x198   :  { %v177_v54 = vmul.f32 0.35355338, %v174_v52 }
 0x19a   :  { %v179_v55 = vadd.f32 %v2160_v53, %v177_v54 }
 0x19c   :  { %v180_v56 = vsel %vm150_vm5, %v179_v55, -inf }
 0x19d   :  { %181 = vmax.xlane.f32.xlu0 %v180_v56 }
 0x210   :  { %v182_v57 = vpop.xlane.xlu0 %181 }
 0x211   :  { %v183_v58 = vsub.f32 %v179_v55, %v182_v57 }
 0x213   :  { %v184_v59 = vmul.f32 1.442695, %v183_v58 }
 0x215   :  { %1934 = vpow2.f32 %v184_v59 }
 0x21b   :  { %v1935_v60 = vpop.eup %1934 }
 0x21c   :  { %v186_v61 = vsel %vm150_vm5, %v1935_v60, 0.0 }
 0x21d   :  { %187 = vadd.xlane.f32.xlu1 %v186_v61  ;;  %v1808_v61 = vld [vmem:[%s2685_s6 + $0x78] sm:$0xff] }
 0x290   :  { %v188_v62 = vpop.xlane.xlu1 %187 }
 0x291   :  { %1936 = vrcp.f32 %v188_v62  ;;  %v1807_v62 = vld [vmem:[%s2685_s6 + $0x70] sm:$0xff] }
 0x297   :  { %v1937_v63 = vpop.eup %1936 }
 0x298   :  { %v190_v1 = vmul.f32 %v1937_v63, %v1935_v60  ;;  %v1806_v63 = vld [vmem:[%s2685_s6 + $0x68] sm:$0xff] }
 0x29a   :  { %1751 = vmatmul.msk.f32.vlgmr.msrb.gmra.mxu3 %vm150_vm5, %v190_v1  ;;  %v1805_v1 = vld [vmem:[%s2685_s6 + $0x60] sm:$0xff] }
 0x29b   :  { %419 = vmatpush.msrb.mxu3 %v1777_v2 }
 0x29d   :  { %420 = vmatpush.msrb.mxu3 %v1776_v3 }
 0x29f   :  { %421 = vmatpush.msrb.mxu3 %v1775_v4 }
 0x2a1   :  { %422 = vmatpush.msrb.mxu3 %v1774_v5 }
 0x2a2   :  { %1768 = vmatmul.msk.f32.vlgmr.msra.gmra.mxu3 %vm150_vm5, %v237_v6 }
 0x2aa   :  { %1778 = vmatmul.msk.f32.vlgmr.msrb.gmra.mxu3 %vm47_vm0, %v2140_v46 }
 0x31d   :  { %v211_v8 = vpop.f32.mrf.mxu3 }
 0x31e   :  { %1773 = vmatmul.msk.f32.vlgmr.msra.gmra.mxu2 %vm150_vm5, %v211_v8 }
 0x325   :  { %v313_v9 = vpop.f32.mrf.mxu3 }
 0x326   :  { %v316_v11 = vmul.f32 0.35355338, %v313_v9 }
 0x328   :  { %v319_v12 = vadd.f32 %v2188_v10, %v316_v11 }
 0x32a   :  { %v320_v13 = vsel %vm150_vm5, %v319_v12, -inf }
 0x32b   :  { %321 = vmax.xlane.f32.xlu1 %v320_v13 }
 0x32d   :  { %v424_v40 = vpop.f32.mrf.mxu3 }
 0x39e   :  { %v322_v14 = vpop.xlane.xlu1 %321 }
 0x39f   :  { %v323_v15 = vsub.f32 %v319_v12, %v322_v14  ;;  %v2288_v12 = vld [vmem:[%s2686_s1 + $0x18] sm:$0xff] }
 0x3a1   :  { %v324_v16 = vmul.f32 1.442695, %v323_v15  ;;  %v399_v44 = vpop.f32.mrf.mxu2 }
 0x3a3   :  { %1938 = vpow2.f32 %v324_v16 }
 0x3a9   :  { %v1939_v17 = vpop.eup %1938 }
 0x3aa   :  { %v326_v18 = vsel %vm150_vm5, %v1939_v17, 0.0 }
 0x3ab   :  { %327 = vadd.xlane.f32.xlu2 %v326_v18 }
 0x41e   :  { %v328_v23 = vpop.xlane.xlu2 %327 }
 0x41f   :  { %1940 = vrcp.f32 %v328_v23 }
 0x425   :  { %v1941_v24 = vpop.eup %1940 }
 0x426   :  { %v330_v25 = vmul.f32 %v1941_v24, %v1939_v17 }
 0x428   :  { %1770 = vmatmul.msk.f32.vlgmr.msra.gmra.mxu0 %vm150_vm5, %v330_v25 }
 0x429   :  { %561 = vmatpush.msra.mxu0 %v1793_v43 }
 0x430   :  { %1783 = vmatmul.msk.f32.vlgmr.msrb.gmra.mxu0 %vm47_vm0, %v2140_v46 }
 0x4a5   :  { %v351_v33 = vpop.f32.mrf.mxu0 }
 0x4a6   :  { %1772 = vmatmul.msk.f32.vlgmr.msra.gmra.mxu1 %vm150_vm5, %v351_v33  ;;  %v784_v33 = vld [vmem:[%s2690_s9 + $0x10] sm:$0xff] }
 0x4a7   :  { %584 = vmatpush.msra.mxu1 %v1798_v32  ;;  %v785_v32 = vld [vmem:[%s2690_s9 + $0x18] sm:$0xff] }
 0x4a9   :  { %585 = vmatpush.msra.mxu1 %v1797_v34  ;;  %v756_v34 = vld [vmem:[%s2689_s8 + $0x8] sm:$0xff] }
 0x4ab   :  { %586 = vmatpush.msra.mxu1 %v1796_v35  ;;  %v783_v35 = vld [vmem:[%s2690_s9 + $0x8] sm:$0xff] }
 0x4ad   :  { %v449_v38 = vpop.f32.mrf.mxu0  ;;  %587 = vmatpush.msra.mxu1 %v1795_v36  ;;  %v755_v36 = vld [vmem:[%s2689_s8] sm:$0xff] }
 0x4ae   :  { %1788 = vmatmul.msk.f32.vlgmr.msrb.gmra.mxu1 %vm47_vm0, %v2140_v46  ;;  %1789 = vmatpush.xpose.msk.msrb.mxu2 %vm150_vm5, %v449_v38 }
 0x4b1   :  { %1790 = vmatmul.msk.f32.vlgmr.msrb.gmra.mxu2 %vm150_vm5, %v424_v40 }
 0x4b2   :  { %609 = vmatpush.msra.mxu2 %v1803_v37  ;;  %v782_v37 = vld [vmem:[%s2690_s9] sm:$0xff] }
 0x4b4   :  { %610 = vmatpush.msra.mxu2 %v1802_v39 }
 0x4b6   :  { %611 = vmatpush.msra.mxu2 %v1801_v41  ;;  %1799 = vmatmul.msk.f32.vlgmr.msra.gmra.mxu1 %vm47_vm0, %v2140_v46 }
 0x4b8   :  { %612 = vmatpush.msra.mxu2 %v1800_v42 }
 0x4b9   :  { %1804 = vmatmul.msk.f32.vlgmr.msra.gmra.mxu2 %vm47_vm0, %v2140_v46 }
 0x4ba   :  { %726 = vmatpush.msrb.mxu2 %v1814_v20 }
 0x523   :  { %v376_v45 = vpop.f32.mrf.mxu1 }
 0x524   :  { %v400_v47 = vadd.f32 %v399_v44, %v376_v45 }
 0x52b   :  { %v474_v48 = vpop.f32.mrf.mxu1 }
 0x52c   :  { %536 = vmatpush.msra.mxu3 %v474_v48  ;;  %v1926_v48 = vld [vmem:[%s2688_s3] ss:$0 sm:$0xff] }
 0x52e   :  { %634 = vmatpush.msrb.mxu3 %v1808_v61  ;;  %v827_v61 = vld [vmem:[%s2691_s10] sm:$0xff] }
 0x530   :  { %635 = vmatpush.msrb.mxu3 %v1807_v62 }
 0x532   :  { %636 = vmatpush.msrb.mxu3 %v1806_v63 }
 0x533   :  { %v589_v6 = vpop.f32.mrf.mxu1 }
 0x534   :  { %v500_v49 = vpop.f32.mrf.mxu2  ;;  %637 = vmatpush.msrb.mxu3 %v1805_v1 }
 0x535   :  { %v503_v51 = vmul.f32 0.35355338, %v500_v49 }
 0x537   :  { %v506_v52 = vadd.f32 %v2262_v50, %v503_v51 }
 0x539   :  { %v507_v54 = vsel %vm150_vm5, %v506_v52, -inf }
 0x53a   :  { %508 = vmax.xlane.f32.xlu2 %v507_v54  ;;  %v834_v54 = vld [vmem:[%s2691_s10 + $0x38] sm:$0xff] }
 0x53c   :  { %v614_v55 = vpop.f32.mrf.mxu2 }
 0x53d   :  { %1810 = vmatpush.xpose.msk.msrb.mxu0 %vm150_vm5, %v614_v55  ;;  %v833_v55 = vld [vmem:[%s2691_s10 + $0x30] sm:$0xff] }
 0x5ad   :  { %v509_v56 = vpop.xlane.xlu2 %508 }
 0x5ae   :  { %v510_v57 = vsub.f32 %v506_v52, %v509_v56  ;;  %v832_v56 = vld [vmem:[%s2691_s10 + $0x28] sm:$0xff] }
 0x5b0   :  { %v511_v58 = vmul.f32 1.442695, %v510_v57  ;;  %v831_v57 = vld [vmem:[%s2691_s10 + $0x20] sm:$0xff] }
 0x5b2   :  { %1942 = vpow2.f32 %v511_v58  ;;  %v830_v58 = vld [vmem:[%s2691_s10 + $0x18] sm:$0xff] }
 0x5b8   :  { %v1943_v59 = vpop.eup %1942 }
 0x5b9   :  { %v513_v60 = vsel %vm150_vm5, %v1943_v59, 0.0 }
 0x5ba   :  { %514 = vadd.xlane.f32.xlu0 %v513_v60  ;;  %v828_v60 = vld [vmem:[%s2691_s10 + $0x8] sm:$0xff] }
 0x62d   :  { %v515_v2 = vpop.xlane.xlu0 %514 }
 0x62e   :  { %1944 = vrcp.f32 %v515_v2 }
 0x634   :  { %v1945_v3 = vpop.eup %1944 }
 0x635   :  { %v517_v4 = vmul.f32 %v1945_v3, %v1943_v59  ;;  %v829_v59 = vld [vmem:[%s2691_s10 + $0x10] sm:$0xff] }
 0x637   :  { %1792 = vmatmul.msk.f32.vlgmr.msra.gmra.mxu3 %vm150_vm5, %v517_v4 }
 0x638   :  { %774 = vmatpush.msra.mxu3 %v758_v31  ;;  %v1827_v31 = vld [vmem:[%s2684_s5 + $0x88] sm:$0xff] }
 0x63f   :  { %1809 = vmatmul.msk.f32.vlgmr.msrb.gmra.mxu3 %vm47_vm0, %v2140_v46 }
 0x6ba   :  { %v538_v5 = vpop.f32.mrf.mxu3 }
 0x6bb   :  { %1794 = vmatmul.msk.f32.vlgmr.msra.gmra.mxu0 %vm150_vm5, %v538_v5 }
 0x6bc   :  { %798 = vmatpush.msra.mxu0 %v785_v32  ;;  %v1832_v32 = vld [vmem:[%s2685_s6 + $0x88] sm:$0xff] }
 0x6be   :  { %799 = vmatpush.msra.mxu0 %v784_v33  ;;  %v1821_v33 = vld [vmem:[%s2683_s4 + $0x80] sm:$0xff] }
 0x6c0   :  { %800 = vmatpush.msra.mxu0 %v783_v35  ;;  %v1831_v35 = vld [vmem:[%s2685_s6 + $0x80] sm:$0xff] }
 0x6c2   :  { %v639_v7 = vpop.f32.mrf.mxu3  ;;  %801 = vmatpush.msra.mxu0 %v782_v37  ;;  %v1843_v37 = vld [vmem:[%s2683_s4 + $0xb8] sm:$0xff] }
 0x6c3   :  { %1811 = vmatmul.msk.f32.vlgmr.msrb.gmra.mxu0 %vm150_vm5, %v589_v6  ;;  %701 = vmatpush.msrb.mxu1 %v639_v7 }
 0x6c5   :  { %847 = vmatpush.msra.mxu1 %v834_v54 }
 0x6c7   :  { %848 = vmatpush.msra.mxu1 %v833_v55 }
 0x6c9   :  { %849 = vmatpush.msra.mxu1 %v832_v56 }
 0x6cb   :  { %850 = vmatpush.msra.mxu1 %v831_v57 }
 0x6cd   :  { %851 = vmatpush.msra.mxu1 %v830_v58 }
 0x6cf   :  { %852 = vmatpush.msra.mxu1 %v829_v59  ;;  %v1853_v59 = vld [vmem:[%s2685_s6 + $0xb8] sm:$0xff] }
 0x6d1   :  { %853 = vmatpush.msra.mxu1 %v828_v60 }
 0x6d3   :  { %854 = vmatpush.msra.mxu1 %v827_v61  ;;  %v1852_v61 = vld [vmem:[%s2685_s6 + $0xb0] sm:$0xff] }
 0x738   :  { %v563_v8 = vpop.f32.mrf.mxu0 }
 0x739   :  { %v566_v9 = vadd.f32 %v563_v8, %v400_v47 }
 0x740   :  { %v665_v11 = vpop.f32.mrf.mxu0 }
 0x741   :  { %v668_v13 = vmul.f32 0.35355338, %v665_v11 }
 0x743   :  { %v671_v14 = vadd.f32 %v2288_v12, %v668_v13 }
 0x745   :  { %v672_v46 = vsel %vm150_vm5, %v671_v14, -inf }
 0x746   :  { %673 = vmax.xlane.f32.xlu1 %v672_v46 }
 0x7b9   :  { %v674_v15 = vpop.xlane.xlu1 %673 }
 0x7ba   :  { %v675_v16 = vsub.f32 %v671_v14, %v674_v15 }
 0x7bc   :  { %v676_v17 = vmul.f32 1.442695, %v675_v16 }
 0x7be   :  { %1946 = vpow2.f32 %v676_v17 }
 0x7c4   :  { %v1947_v18 = vpop.eup %1946 }
 0x7c5   :  { %v678_v19 = vsel %vm150_vm5, %v1947_v18, 0.0 }
 0x7c6   :  { %679 = vadd.xlane.f32.xlu2 %v678_v19 }
 0x839   :  { %v680_v21 = vpop.xlane.xlu2 %679 }
 0x83a   :  { %1948 = vrcp.f32 %v680_v21  ;;  %v1824_v21 = vld [vmem:[%s2683_s4 + $0x98] sm:$0xff] }
 0x83b   :  { %903 = vmatpush.msra.mxu2 %v1824_v21  ;;  %v1839_v21 = vld [vmem:[%s2687_s7 + $0x20] sm:$0xff] }
 0x840   :  { %v1949_v22 = vpop.eup %1948 }
 0x841   :  { %v682_v23 = vmul.f32 %v1949_v22, %v1947_v18  ;;  %v1829_v22 = vld [vmem:[%s2684_s5 + $0x98] sm:$0xff] }
 0x843   :  { %1813 = vmatmul.msk.f32.vlgmr.msrb.gmra.mxu1 %vm150_vm5, %v682_v23  ;;  %v1834_v23 = vld [vmem:[%s2685_s6 + $0x98] sm:$0xff] }
 0x844   :  { %953 = vmatpush.msrb.mxu0 %v1834_v23 }
 0x8c0   :  { %v703_v24 = vpop.f32.mrf.mxu1 }
 0x8c1   :  { %1815 = vmatmul.msk.f32.vlgmr.msrb.gmra.mxu2 %vm150_vm5, %v703_v24  ;;  %v1848_v24 = vld [vmem:[%s2684_s5 + $0xb8] sm:$0xff] }
 0x8c2   :  { %1067 = vmatpush.msrb.mxu1 %v1848_v24 }
 0x944   :  { %v728_v25 = vpop.f32.mrf.mxu2 }
 0x945   :  { %v731_v26 = vadd.f32 %v728_v25, %v566_v9  ;;  %v1823_v25 = vld [vmem:[%s2683_s4 + $0x90] sm:$0xff] }
 0x946   :  { %904 = vmatpush.msra.mxu2 %v1823_v25 }
 0x947   :  { %v2299_v28 = vadd.f32 %v731_v26, %v2056_v0  ;;  %v757_v0 = vld [vmem:[%s2689_s8 + $0x10] sm:$0xff] }
 0x948   :  { %775 = vmatpush.msra.mxu3 %v757_v0  ;;  %v1828_v26 = vld [vmem:[%s2684_s5 + $0x90] sm:$0xff]  ;;  %v1846_v0 = vld [vmem:[%s2684_s5 + $0xa8] sm:$0xff] }
 0x949   :  { %v734_v29 = vmul.f32 %v2299_v28, %v2299_v28 }
 0x94a   :  { %776 = vmatpush.msra.mxu3 %v756_v34  ;;  %v1826_v34 = vld [vmem:[%s2684_s5 + $0x80] sm:$0xff] }
 0x94b   :  { %v735_v30 = vsel %vm47_vm0, %v734_v29, 0.0  ;;  %v1847_v29 = vld [vmem:[%s2684_s5 + $0xb0] sm:$0xff] }
 0x94c   :  { %736 = vadd.xlane.f32.xlu0 %v735_v30  ;;  %777 = vmatpush.msra.mxu3 %v755_v36  ;;  %v1822_v30 = vld [vmem:[%s2683_s4 + $0x88] sm:$0xff]  ;;  %v1845_v36 = vld [vmem:[%s2684_s5 + $0xa0] sm:$0xff] }
 0x94d   :  { %1068 = vmatpush.msrb.mxu1 %v1847_v29  ;;  %905 = vmatpush.msra.mxu2 %v1822_v30 }
 0x94e   :  { %928 = vmatpush.msrb.mxu3 %v1829_v22 }
 0x94f   :  { %1069 = vmatpush.msrb.mxu1 %v1846_v0  ;;  %906 = vmatpush.msra.mxu2 %v1821_v33  ;;  %v1869_v0 = vld [vmem:[%s2684_s5 + $0xd8] sm:$0xff]  ;;  %v1868_v33 = vld [vmem:[%s2684_s5 + $0xd0] sm:$0xff] }
 0x950   :  { %929 = vmatpush.msrb.mxu3 %v1828_v26 }
 0x951   :  { %1070 = vmatpush.msrb.mxu1 %v1845_v36 }
 0x952   :  { %930 = vmatpush.msrb.mxu3 %v1827_v31 }
 0x954   :  { %931 = vmatpush.msrb.mxu3 %v1826_v34  ;;  %v1866_v34 = vld [vmem:[%s2684_s5 + $0xc0] sm:$0xff] }
 0x9bf   :  { %v737_v38 = vpop.xlane.xlu0 %736 }
 0x9c0   :  { %v738_v39 = vmul.f32 %v737_v38, %v2115_v27  ;;  %v1842_v38 = vld [vmem:[%s2683_s4 + $0xb0] sm:$0xff] }
 0x9c2   :  { %v739_v40 = vadd.f32 1e-06, %v738_v39  ;;  %v1841_v39 = vld [vmem:[%s2683_s4 + $0xa8] sm:$0xff] }
 0x9c4   :  { %1950 = vrsqrt.f32 %v739_v40  ;;  %vm746_vm7 = vweird.f32 %v739_v40 }
 0x9ca   :  { %v1951_v41 = vpop.eup %1950 }
 0x9cb   :  { %v741_v42 = vmul.f32 %v1951_v41, %v739_v40  ;;  %vm747_vm6 = vweird.f32 %v1951_v41 }
 0x9cc   :  { %vm748_vm8 = vmor %vm746_vm7, %vm747_vm6 }
 0x9cd   :  { %v742_v43 = vmul.f32 %v1951_v41, %v741_v42 }
 0x9cf   :  { %v743_v44 = vmul.f32 0.5, %v742_v43 }
 0x9d1   :  { %v744_v45 = vsub.f32 1.5, %v743_v44 }
 0x9d3   :  { %v745_v47 = vmul.f32 %v1951_v41, %v744_v45 }
 0x9d5   :  { %v749_v49 = vsel %vm748_vm8, %v1951_v41, %v745_v47  ;;  %v1840_v41 = vld [vmem:[%s2683_s4 + $0xa0] sm:$0xff] }
 0x9d6   :  { %v750_v51 = vmul.f32 %v749_v49, %v2299_v28 }
 0x9d8   :  { %v754_v52 = vmul.f32 %v1926_v48, %v750_v51 }
 0x9da   :  { %1816 = vmatmul.msk.f32.vlgmr.msra.gmra.mxu3 %vm47_vm0, %v754_v52  ;;  %1817 = vmatmul.msk.f32.vlgmr.msra.gmra.mxu0 %vm47_vm0, %v754_v52  ;;  %v1927_v52 = vld [vmem:[%s2682_s2 + $0x1] ss:$0 sm:$0xff] }
 0xa57   :  { %v803_v15 = vpop.f32.mrf.mxu0 }
 0xa5d   :  { %v779_v62 = vpop.f32.mrf.mxu3 }
 0xa5e   :  { %v1818_v63 = vmul.f32 -1.442695, %v779_v62 }
 0xa60   :  { %1952 = vpow2.f32 %v1818_v63  ;;  %v1851_v63 = vld [vmem:[%s2685_s6 + $0xa8] sm:$0xff] }
 0xa66   :  { %v1953_v1 = vpop.eup %1952 }
 0xa67   :  { %v809_v2 = vadd.f32 1.0, %v1953_v1  ;;  %v1850_v1 = vld [vmem:[%s2685_s6 + $0xa0] sm:$0xff] }
 0xa69   :  { %1954 = vrcp.f32 %v809_v2  ;;  %v821_v6 = vand.u32 2147483648, %v809_v2  ;;  %v819_v8 = vand.u32 2147483647, %v809_v2  ;;  %vm815_vm10 = vweird.f32 %v809_v2 }
 0xa6b   :  { %v822_v11 = vor.u32 1.1754944e-38, %v821_v6  ;;  %vm820_vm12 = vcmp.eq.f32.partialorder %v819_v8, 8.507059e+37 }
 0xa6f   :  { %v1955_v3 = vpop.eup %1954 }
 0xa70   :  { %v811_v4 = vmul.f32 %v1955_v3, %v809_v2  ;;  %vm816_vm9 = vweird.f32 %v1955_v3 }
 0xa71   :  { %vm817_vm11 = vmor %vm815_vm10, %vm816_vm9 }
 0xa72   :  { %v812_v5 = vsub.f32 1.0, %v811_v4 }
 0xa74   :  { %v813_v7 = vmul.f32 %v1955_v3, %v812_v5 }
 0xa76   :  { %v814_v9 = vadd.f32 %v1955_v3, %v813_v7 }
 0xa78   :  { %v818_v13 = vsel %vm817_vm11, %v1955_v3, %v814_v9 }
 0xa79   :  { %v823_v14 = vsel %vm820_vm12, %v822_v11, %v818_v13 }
 0xa7a   :  { %v825_v46 = vmul.f32 %v823_v14, %v779_v62 }
 0xa7c   :  { %v826_v16 = vmul.f32 %v825_v46, %v803_v15 }
 0xa7e   :  { %1819 = vmatmul.msk.f32.vlgmr.msra.gmra.mxu1 %vm835_vm13, %v826_v16  ;;  %v1863_v16 = vld [vmem:[%s2683_s4 + $0xd0] sm:$0xff] }
 0xafb   :  { %v856_v17 = vpop.f32.mrf.mxu1 }
 0xafc   :  { %v2361_v18 = vadd.f32 %v856_v17, %v2299_v28  ;;  %v1833_v28 = vld [vmem:[%s2685_s6 + $0x90] sm:$0xff]  ;;  %v1862_v17 = vld [vmem:[%s2683_s4 + $0xc8] sm:$0xff] }
 0xafd   :  { %954 = vmatpush.msrb.mxu0 %v1833_v28 }
 0xafe   :  { %v862_v19 = vmul.f32 %v2361_v18, %v2361_v18 }
 0xaff   :  { %955 = vmatpush.msrb.mxu0 %v1832_v32 }
 0xb00   :  { %v863_v20 = vsel %vm47_vm0, %v862_v19, 0.0  ;;  %v1861_v19 = vld [vmem:[%s2683_s4 + $0xc0] sm:$0xff] }
 0xb01   :  { %864 = vadd.xlane.f32.xlu1 %v863_v20  ;;  %956 = vmatpush.msrb.mxu0 %v1831_v35 }
 0xb03   :  { %1042 = vmatpush.msra.mxu0 %v1843_v37 }
 0xb05   :  { %1043 = vmatpush.msra.mxu0 %v1842_v38  ;;  %v1858_v38 = vld [vmem:[%s2687_s7 + $0x28] sm:$0xff] }
 0xb06   :  { %1182 = vmatpush.msra.mxu1 %v1858_v38  ;;  %v1905_v38 = vld [vmem:[%s2689_s8 + $0x38] sm:$0xff] }
 0xb07   :  { %1044 = vmatpush.msra.mxu0 %v1841_v39  ;;  %v1874_v39 = vld [vmem:[%s2685_s6 + $0xd8] sm:$0xff] }
 0xb09   :  { %1045 = vmatpush.msra.mxu0 %v1840_v41  ;;  %v1872_v41 = vld [vmem:[%s2685_s6 + $0xc8] sm:$0xff] }
 0xb74   :  { %v865_v40 = vpop.xlane.xlu1 %864 }
 0xb75   :  { %v866_v42 = vmul.f32 %v865_v40, %v2115_v27  ;;  %v1873_v40 = vld [vmem:[%s2685_s6 + $0xd0] sm:$0xff] }
 0xb77   :  { %v867_v43 = vadd.f32 1e-06, %v866_v42  ;;  %v1871_v42 = vld [vmem:[%s2685_s6 + $0xc0] sm:$0xff] }
 0xb79   :  { %1956 = vrsqrt.f32 %v867_v43  ;;  %vm874_vm15 = vweird.f32 %v867_v43 }
 0xb7f   :  { %v1957_v44 = vpop.eup %1956 }
 0xb80   :  { %v869_v45 = vmul.f32 %v1957_v44, %v867_v43  ;;  %vm875_vm14 = vweird.f32 %v1957_v44  ;;  %v1884_v43 = vld [vmem:[%s2683_s4 + $0xf8] sm:$0xff] }
 0xb81   :  { %vm876_vm1 = vmor %vm874_vm15, %vm875_vm14 }
 0xb82   :  { %v870_v47 = vmul.f32 %v1957_v44, %v869_v45  ;;  %v1883_v45 = vld [vmem:[%s2683_s4 + $0xf0] sm:$0xff] }
 0xb84   :  { %v871_v48 = vmul.f32 0.5, %v870_v47  ;;  %v1882_v47 = vld [vmem:[%s2683_s4 + $0xe8] sm:$0xff] }
 0xb86   :  { %v872_v49 = vsub.f32 1.5, %v871_v48  ;;  %v1881_v48 = vld [vmem:[%s2683_s4 + $0xe0] sm:$0xff] }
 0xb88   :  { %v873_v51 = vmul.f32 %v1957_v44, %v872_v49  ;;  %v1889_v49 = vld [vmem:[%s2684_s5 + $0xf8] sm:$0xff] }
 0xb8a   :  { %v877_v54 = vsel %vm876_vm1, %v1957_v44, %v873_v51 }
 0xb8b   :  { %v878_v55 = vmul.f32 %v877_v54, %v2361_v18 }
 0xb8d   :  { %v2431_v56 = vmul.f32 %v1927_v52, %v878_v55  ;;  %v1888_v52 = vld [vmem:[%s2684_s5 + $0xf0] sm:$0xff]  ;;  %v1887_v55 = vld [vmem:[%s2684_s5 + $0xe8] sm:$0xff] }
 0xb8f   :  { %1825 = vmatmul.msk.f32.vlgmr.msra.gmra.mxu2 %vm47_vm0, %v2431_v56  ;;  %1830 = vmatmul.msk.f32.vlgmr.msrb.gmra.mxu3 %vm47_vm0, %v2431_v56 }
 0xb90   :  { %1835 = vmatmul.msk.f32.vlgmr.msrb.gmra.mxu0 %vm47_vm0, %v2431_v56  ;;  %1849 = vmatmul.msk.f32.vlgmr.msrb.gmra.mxu1 %vm47_vm0, %v2431_v56 }
 0xb91   :  { %1277 = vmatpush.msrb.mxu1 %v1874_v39  ;;  %v1910_v39 = vld [vmem:[%s2690_s9 + $0x38] sm:$0xff] }
 0xb93   :  { %1278 = vmatpush.msrb.mxu1 %v1873_v40  ;;  %v1909_v40 = vld [vmem:[%s2690_s9 + $0x30] sm:$0xff] }
 0xb95   :  { %1279 = vmatpush.msrb.mxu1 %v1872_v41  ;;  %v1903_v41 = vld [vmem:[%s2689_s8 + $0x28] sm:$0xff] }
 0xb97   :  { %1280 = vmatpush.msrb.mxu1 %v1871_v42  ;;  %v1908_v42 = vld [vmem:[%s2690_s9 + $0x28] sm:$0xff] }
 0xb98   :  { %1844 = vmatmul.msk.f32.vlgmr.msra.gmra.mxu0 %vm47_vm0, %v2431_v56 }
 0xc0d   :  { %v958_v57 = vpop.f32.mrf.mxu0  ;;  %v1072_v58 = vpop.f32.mrf.mxu1 }
 0xc0e   :  { %1018 = vmatpush.msra.mxu3 %v958_v57  ;;  %v1886_v57 = vld [vmem:[%s2684_s5 + $0xe0] sm:$0xff] }
 0xc10   :  { %1855 = vmatpush.xpose.msk.msrb.mxu3 %vm150_vm5, %v1072_v58  ;;  %v1879_v58 = vld [vmem:[%s2687_s7 + $0x30] sm:$0xff] }
 0xc12   :  { %v933_v60 = vpop.f32.mrf.mxu3  ;;  %v908_v62 = vpop.f32.mrf.mxu2 }
 0xc13   :  { %1836 = vmatpush.xpose.msk.msrb.mxu2 %vm150_vm5, %v933_v60 }
 0xc15   :  { %v1047_v20 = vpop.f32.mrf.mxu0 }
 0xc16   :  { %1837 = vmatmul.msk.f32.vlgmr.msrb.gmra.mxu2 %vm150_vm5, %v908_v62 }
 0xc17   :  { %1092 = vmatpush.msra.mxu2 %v1853_v59 }
 0xc19   :  { %1093 = vmatpush.msra.mxu2 %v1852_v61 }
 0xc1b   :  { %1094 = vmatpush.msra.mxu2 %v1851_v63 }
 0xc1d   :  { %1095 = vmatpush.msra.mxu2 %v1850_v1 }
 0xc1e   :  { %1854 = vmatmul.msk.f32.vlgmr.msra.gmra.mxu2 %vm47_vm0, %v2431_v56 }
 0xc1f   :  { %1205 = vmatpush.msrb.mxu2 %v1839_v21 }
 0xc99   :  { %v984_v2 = vpop.f32.mrf.mxu2 }
 0xc9a   :  { %v987_v3 = vmul.f32 0.35355338, %v984_v2 }
 0xc9c   :  { %v988_v4 = vadd.f32 %v987_v3, %v2160_v53  ;;  %v1864_v53 = vld [vmem:[%s2683_s4 + $0xd8] sm:$0xff] }
 0xc9e   :  { %v989_v5 = vsel %vm150_vm5, %v988_v4, -inf }
 0xc9f   :  { %990 = vmax.xlane.f32.xlu2 %v989_v5 }
 0xca1   :  { %v1097_v6 = vpop.f32.mrf.mxu2 }
 0xca2   :  { %1157 = vmatpush.msrb.mxu0 %v1097_v6 }
 0xca4   :  { %1252 = vmatpush.msra.mxu0 %v1869_v0 }
 0xca6   :  { %1253 = vmatpush.msra.mxu0 %v1868_v33 }
 0xd12   :  { %v991_v7 = vpop.xlane.xlu2 %990 }
 0xd13   :  { %v992_v8 = vsub.f32 %v988_v4, %v991_v7 }
 0xd15   :  { %v993_v9 = vmul.f32 1.442695, %v992_v8 }
 0xd17   :  { %1958 = vpow2.f32 %v993_v9 }
 0xd1d   :  { %v1959_v11 = vpop.eup %1958 }
 0xd1e   :  { %v995_v13 = vsel %vm150_vm5, %v1959_v11, 0.0 }
 0xd1f   :  { %996 = vadd.xlane.f32.xlu0 %v995_v13  ;;  %v1892_v13 = vld [vmem:[%s2685_s6 + $0xe8] sm:$0xff] }
 0xd92   :  { %v997_v14 = vpop.xlane.xlu0 %996 }
 0xd93   :  { %1960 = vrcp.f32 %v997_v14  ;;  %v1891_v14 = vld [vmem:[%s2685_s6 + $0xe0] sm:$0xff] }
 0xd99   :  { %v1961_v46 = vpop.eup %1960 }
 0xd9a   :  { %v999_v15 = vmul.f32 %v1961_v46, %v1959_v11  ;;  %v1894_v11 = vld [vmem:[%s2685_s6 + $0xf8] sm:$0xff] }
 0xd9c   :  { %1838 = vmatmul.msk.f32.vlgmr.msra.gmra.mxu3 %vm150_vm5, %v999_v15 }
 0xd9d   :  { %1227 = vmatpush.msra.mxu3 %v1864_v53 }
 0xd9f   :  { %1228 = vmatpush.msra.mxu3 %v1863_v16 }
 0xda1   :  { %1229 = vmatpush.msra.mxu3 %v1862_v17 }
 0xda3   :  { %1230 = vmatpush.msra.mxu3 %v1861_v19 }
 0xda4   :  { %1856 = vmatmul.msk.f32.vlgmr.msrb.gmra.mxu3 %vm150_vm5, %v1047_v20 }
 0xdac   :  { %1865 = vmatmul.msk.f32.vlgmr.msra.gmra.mxu3 %vm47_vm0, %v2431_v56 }
 0xe1f   :  { %v1020_v22 = vpop.f32.mrf.mxu3 }
 0xe20   :  { %1860 = vmatmul.msk.f32.vlgmr.msrb.gmra.mxu2 %vm150_vm5, %v1020_v22 }
 0xe27   :  { %v1123_v23 = vpop.f32.mrf.mxu3 }
 0xe28   :  { %v1126_v24 = vmul.f32 0.35355338, %v1123_v23 }
 0xe2a   :  { %v1127_v25 = vadd.f32 %v2188_v10, %v1126_v24  ;;  %v1867_v10 = vld [vmem:[%s2684_s5 + $0xc8] sm:$0xff] }
 0xe2b   :  { %1254 = vmatpush.msra.mxu0 %v1867_v10 }
 0xe2c   :  { %v1128_v26 = vsel %vm150_vm5, %v1127_v25, -inf }
 0xe2d   :  { %1129 = vmax.xlane.f32.xlu1 %v1128_v26  ;;  %1255 = vmatpush.msra.mxu0 %v1866_v34 }
 0xe2f   :  { %v1232_v54 = vpop.f32.mrf.mxu3 }
 0xea0   :  { %v1130_v28 = vpop.xlane.xlu1 %1129 }
 0xea1   :  { %v1131_v29 = vsub.f32 %v1127_v25, %v1130_v28 }
 0xea3   :  { %v1132_v30 = vmul.f32 1.442695, %v1131_v29  ;;  %v1207_v59 = vpop.f32.mrf.mxu2 }
 0xea5   :  { %1962 = vpow2.f32 %v1132_v30 }
 0xeab   :  { %v1963_v31 = vpop.eup %1962 }
 0xeac   :  { %v1134_v32 = vsel %vm150_vm5, %v1963_v31, 0.0 }
 0xead   :  { %1135 = vadd.xlane.f32.xlu2 %v1134_v32 }
 0xf20   :  { %v1136_v35 = vpop.xlane.xlu2 %1135 }
 0xf21   :  { %1964 = vrcp.f32 %v1136_v35 }
 0xf27   :  { %v1965_v36 = vpop.eup %1964 }
 0xf28   :  { %v1138_v37 = vmul.f32 %v1965_v36, %v1963_v31  ;;  %v1899_v31 = vld [vmem:[%s2687_s7 + $0x38] sm:$0xff] }
 0xf2a   :  { %1857 = vmatmul.msk.f32.vlgmr.msrb.gmra.mxu0 %vm150_vm5, %v1138_v37 }
 0xf2b   :  { %1367 = vmatpush.msrb.mxu0 %v1879_v58  ;;  %v1928_v58 = vld [vmem:[%s2688_s3 + $0x1] ss:$0 sm:$0xff] }
 0xf32   :  { %1870 = vmatmul.msk.f32.vlgmr.msra.gmra.mxu0 %vm47_vm0, %v2431_v56 }
 0xfa7   :  { %v1159_v44 = vpop.f32.mrf.mxu0 }
 0xfa8   :  { %1859 = vmatmul.msk.f32.vlgmr.msra.gmra.mxu1 %vm150_vm5, %v1159_v44  ;;  %v1907_v44 = vld [vmem:[%s2690_s9 + $0x20] sm:$0xff] }
 0xfa9   :  { %1390 = vmatpush.msra.mxu1 %v1884_v43  ;;  %v1902_v43 = vld [vmem:[%s2689_s8 + $0x20] sm:$0xff] }
 0xfab   :  { %1391 = vmatpush.msra.mxu1 %v1883_v45 }
 0xfad   :  { %1392 = vmatpush.msra.mxu1 %v1882_v47 }
 0xfaf   :  { %v1257_v51 = vpop.f32.mrf.mxu0  ;;  %1393 = vmatpush.msra.mxu1 %v1881_v48 }
 0xfb0   :  { %1875 = vmatmul.msk.f32.vlgmr.msrb.gmra.mxu1 %vm47_vm0, %v2431_v56  ;;  %1876 = vmatpush.xpose.msk.msra.mxu2 %vm150_vm5, %v1257_v51 }
 0xfb3   :  { %1877 = vmatmul.msk.f32.vlgmr.msra.gmra.mxu2 %vm150_vm5, %v1232_v54 }
 0xfb4   :  { %1415 = vmatpush.msrb.mxu2 %v1889_v49 }
 0xfb6   :  { %1416 = vmatpush.msrb.mxu2 %v1888_v52 }
 0xfb8   :  { %1417 = vmatpush.msrb.mxu2 %v1887_v55  ;;  %1885 = vmatmul.msk.f32.vlgmr.msra.gmra.mxu1 %vm47_vm0, %v2431_v56 }
 0xfba   :  { %1418 = vmatpush.msrb.mxu2 %v1886_v57 }
 0xfbb   :  { %1890 = vmatmul.msk.f32.vlgmr.msrb.gmra.mxu2 %vm47_vm0, %v2431_v56 }
 0xfbc   :  { %1530 = vmatpush.msra.mxu2 %v1899_v31  ;;  %v1694_v31 = vld [vmem:[%s2693_s12 + $0x28] sm:$0xff] }
0x1025   :  { %v1184_v60 = vpop.f32.mrf.mxu1 }
0x1026   :  { %v1208_v61 = vadd.f32 %v1207_v59, %v1184_v60 }
0x102d   :  { %v1282_v62 = vpop.f32.mrf.mxu1 }
0x102e   :  { %1342 = vmatpush.msrb.mxu3 %v1282_v62  ;;  %v1920_v62 = vld [vmem:[%s2691_s10 + $0x78] sm:$0xff] }
0x1030   :  { %1440 = vmatpush.msra.mxu3 %v1894_v11 }
0x1035   :  { %v1395_v17 = vpop.f32.mrf.mxu1 }
0x1036   :  { %v1308_v63 = vpop.f32.mrf.mxu2 }
0x1037   :  { %v1311_v1 = vmul.f32 0.35355338, %v1308_v63  ;;  %v1919_v63 = vld [vmem:[%s2691_s10 + $0x70] sm:$0xff] }
0x1039   :  { %v1312_v2 = vadd.f32 %v2262_v50, %v1311_v1  ;;  %v1893_v50 = vld [vmem:[%s2685_s6 + $0xf0] sm:$0xff]  ;;  %v1918_v1 = vld [vmem:[%s2691_s10 + $0x68] sm:$0xff] }
0x103a   :  { %1441 = vmatpush.msra.mxu3 %v1893_v50 }
0x103b   :  { %v1313_v3 = vsel %vm150_vm5, %v1312_v2, -inf }
0x103c   :  { %1314 = vmax.xlane.f32.xlu0 %v1313_v3  ;;  %1442 = vmatpush.msra.mxu3 %v1892_v13  ;;  %v1916_v3 = vld [vmem:[%s2691_s10 + $0x58] sm:$0xff] }
0x103e   :  { %v1420_v4 = vpop.f32.mrf.mxu2  ;;  %1443 = vmatpush.msra.mxu3 %v1891_v14 }
0x103f   :  { %1896 = vmatpush.xpose.msk.msra.mxu0 %vm150_vm5, %v1420_v4  ;;  %v1915_v4 = vld [vmem:[%s2691_s10 + $0x50] sm:$0xff] }
0x10af   :  { %v1315_v5 = vpop.xlane.xlu0 %1314 }
0x10b0   :  { %v1316_v6 = vsub.f32 %v1312_v2, %v1315_v5  ;;  %v1917_v2 = vld [vmem:[%s2691_s10 + $0x60] sm:$0xff]  ;;  %v1914_v5 = vld [vmem:[%s2691_s10 + $0x48] sm:$0xff] }
0x10b2   :  { %v1317_v7 = vmul.f32 1.442695, %v1316_v6  ;;  %v1913_v6 = vld [vmem:[%s2691_s10 + $0x40] sm:$0xff] }
0x10b4   :  { %1966 = vpow2.f32 %v1317_v7 }
0x10ba   :  { %v1967_v8 = vpop.eup %1966 }
0x10bb   :  { %v1319_v9 = vsel %vm150_vm5, %v1967_v8, 0.0 }
0x10bc   :  { %1320 = vadd.xlane.f32.xlu1 %v1319_v9 }
0x112f   :  { %v1321_v46 = vpop.xlane.xlu1 %1320 }
0x1130   :  { %1968 = vrcp.f32 %v1321_v46 }
0x1136   :  { %v1969_v15 = vpop.eup %1968 }
0x1137   :  { %v1323_v53 = vmul.f32 %v1969_v15, %v1967_v8 }
0x1139   :  { %1878 = vmatmul.msk.f32.vlgmr.msrb.gmra.mxu3 %vm150_vm5, %v1323_v53 }
0x113a   :  { %1580 = vmatpush.msrb.mxu3 %v1905_v38 }
0x1141   :  { %1895 = vmatmul.msk.f32.vlgmr.msra.gmra.mxu3 %vm47_vm0, %v2431_v56 }
0x11bc   :  { %v1344_v16 = vpop.f32.mrf.mxu3 }
0x11bd   :  { %1880 = vmatmul.msk.f32.vlgmr.msrb.gmra.mxu0 %vm150_vm5, %v1344_v16 }
0x11be   :  { %1605 = vmatpush.msrb.mxu0 %v1910_v39 }
0x11c0   :  { %1606 = vmatpush.msrb.mxu0 %v1909_v40 }
0x11c2   :  { %1607 = vmatpush.msrb.mxu0 %v1908_v42 }
0x11c4   :  { %v1445_v19 = vpop.f32.mrf.mxu3  ;;  %1608 = vmatpush.msrb.mxu0 %v1907_v44 }
0x11c5   :  { %1897 = vmatmul.msk.f32.vlgmr.msra.gmra.mxu0 %vm150_vm5, %v1395_v17  ;;  %1505 = vmatpush.msrb.mxu1 %v1445_v19 }
0x11c7   :  { %1654 = vmatpush.msra.mxu1 %v1920_v62 }
0x11c9   :  { %1655 = vmatpush.msra.mxu1 %v1919_v63 }
0x11cb   :  { %1656 = vmatpush.msra.mxu1 %v1918_v1 }
0x11cd   :  { %1657 = vmatpush.msra.mxu1 %v1917_v2 }
0x11cf   :  { %1658 = vmatpush.msra.mxu1 %v1916_v3 }
0x11d1   :  { %1659 = vmatpush.msra.mxu1 %v1915_v4 }
0x11d3   :  { %1660 = vmatpush.msra.mxu1 %v1914_v5 }
0x11d5   :  { %1661 = vmatpush.msra.mxu1 %v1913_v6 }
0x123a   :  { %v1369_v20 = vpop.f32.mrf.mxu0 }
0x123b   :  { %v1372_v21 = vadd.f32 %v1369_v20, %v1208_v61 }
0x1242   :  { %v1471_v22 = vpop.f32.mrf.mxu0 }
0x1243   :  { %v1474_v23 = vmul.f32 0.35355338, %v1471_v22 }
0x1245   :  { %v1475_v24 = vadd.f32 %v2288_v12, %v1474_v23 }
0x1247   :  { %v1476_v25 = vsel %vm150_vm5, %v1475_v24, -inf }
0x1248   :  { %1477 = vmax.xlane.f32.xlu2 %v1476_v25 }
0x12bb   :  { %v1478_v26 = vpop.xlane.xlu2 %1477 }
0x12bc   :  { %v1479_v28 = vsub.f32 %v1475_v24, %v1478_v26 }
0x12be   :  { %v1480_v56 = vmul.f32 1.442695, %v1479_v28 }
0x12c0   :  { %1970 = vpow2.f32 %v1480_v56  ;;  %v1695_v56 = vld [vmem:[%s2693_s12 + $0x30] sm:$0xff] }
0x12c1   :  { %1712 = vmatpush.msrb.mxu2 %v1695_v56 }
0x12c6   :  { %v1971_v29 = vpop.eup %1970 }
0x12c7   :  { %v1482_v30 = vsel %vm150_vm5, %v1971_v29, 0.0 }
0x12c8   :  { %1483 = vadd.xlane.f32.xlu0 %v1482_v30  ;;  %v1693_v30 = vld [vmem:[%s2693_s12 + $0x20] sm:$0xff] }
0x12c9   :  { %1713 = vmatpush.msrb.mxu2 %v1693_v30 }
0x133b   :  { %v1484_v32 = vpop.xlane.xlu0 %1483 }
0x133c   :  { %1972 = vrcp.f32 %v1484_v32  ;;  %v1691_v32 = vld [vmem:[%s2693_s12 + $0x10] sm:$0xff] }
0x133d   :  { %1714 = vmatpush.msrb.mxu2 %v1691_v32 }
0x1342   :  { %v1973_v0 = vpop.eup %1972 }
0x1343   :  { %v1486_v12 = vmul.f32 %v1973_v0, %v1971_v29  ;;  %v1696_v29 = vld [vmem:[%s2693_s12 + $0x38] sm:$0xff] }
0x1344   :  { %v1692_v0 = vld [vmem:[%s2693_s12 + $0x18] sm:$0xff] }
0x1345   :  { %1898 = vmatmul.msk.f32.vlgmr.msrb.gmra.mxu1 %vm150_vm5, %v1486_v12  ;;  %v1689_v12 = vld [vmem:[%s2693_s12] sm:$0xff] }
0x1346   :  { %1715 = vmatpush.msrb.mxu2 %v1689_v12 }
0x13c2   :  { %v1507_v33 = vpop.f32.mrf.mxu1 }
0x13c3   :  { %1900 = vmatmul.msk.f32.vlgmr.msra.gmra.mxu2 %vm150_vm5, %v1507_v33  ;;  %v1690_v33 = vld [vmem:[%s2693_s12 + $0x8] sm:$0xff] }
0x1446   :  { %v1532_v10 = vpop.f32.mrf.mxu2 }
0x1447   :  { %v1535_v34 = vadd.f32 %v1532_v10, %v1372_v21 }
0x1449   :  { %v2582_v35 = vadd.f32 %v1535_v34, %v2361_v18  ;;  %v1904_v18 = vld [vmem:[%s2689_s8 + $0x30] sm:$0xff] }
0x144a   :  { %1581 = vmatpush.msrb.mxu3 %v1904_v18 }
0x144b   :  { %v1539_v36 = vmul.f32 %v2582_v35, %v2582_v35 }
0x144c   :  { %1582 = vmatpush.msrb.mxu3 %v1903_v41  ;;  %v1929_v41 = vld [vmem:[%s2692_s11] ss:$0 sm:$0xff] }
0x144d   :  { %v1540_v37 = vsel %vm47_vm0, %v1539_v36, 0.0 }
0x144e   :  { %1541 = vadd.xlane.f32.xlu1 %v1540_v37  ;;  %1583 = vmatpush.msrb.mxu3 %v1902_v43 }
0x1450   :  { %1732 = vmatpush.msra.mxu3 %v1696_v29 }
0x1452   :  { %1733 = vmatpush.msra.mxu3 %v1694_v31 }
0x1454   :  { %1734 = vmatpush.msra.mxu3 %v1692_v0 }
0x1456   :  { %1735 = vmatpush.msra.mxu3 %v1690_v33 }
0x14c1   :  { %v1542_v45 = vpop.xlane.xlu1 %1541 }
0x14c2   :  { %v1543_v47 = vmul.f32 %v1542_v45, %v2115_v27 }
0x14c4   :  { %v1544_v48 = vadd.f32 1e-06, %v1543_v47 }
0x14c6   :  { %1974 = vrsqrt.f32 %v1544_v48  ;;  %vm1551_vm3 = vweird.f32 %v1544_v48 }
0x14cc   :  { %v1975_v49 = vpop.eup %1974 }
0x14cd   :  { %v1546_v51 = vmul.f32 %v1975_v49, %v1544_v48  ;;  %vm1552_vm2 = vweird.f32 %v1975_v49 }
0x14ce   :  { %vm1553_vm4 = vmor %vm1551_vm3, %vm1552_vm2 }
0x14cf   :  { %v1547_v52 = vmul.f32 %v1975_v49, %v1546_v51 }
0x14d1   :  { %v1548_v54 = vmul.f32 0.5, %v1547_v52 }
0x14d3   :  { %v1549_v55 = vsub.f32 1.5, %v1548_v54 }
0x14d5   :  { %v1550_v57 = vmul.f32 %v1975_v49, %v1549_v55 }
0x14d7   :  { %v1554_v59 = vsel %vm1553_vm4, %v1975_v49, %v1550_v57 }
0x14d8   :  { %v1555_v60 = vmul.f32 %v1554_v59, %v2582_v35 }
0x14da   :  { %v1559_v61 = vmul.f32 %v1928_v58, %v1555_v60 }
0x14dc   :  { %1906 = vmatmul.msk.f32.vlgmr.msrb.gmra.mxu3 %vm47_vm0, %v1559_v61  ;;  %1911 = vmatmul.msk.f32.vlgmr.msrb.gmra.mxu0 %vm47_vm0, %v1559_v61 }
0x1559   :  { %v1610_v22 = vpop.f32.mrf.mxu0 }
0x155f   :  { %v1585_v7 = vpop.f32.mrf.mxu3 }
0x1560   :  { %v1912_v8 = vmul.f32 -1.442695, %v1585_v7 }
0x1562   :  { %1976 = vpow2.f32 %v1912_v8 }
0x1568   :  { %v1977_v9 = vpop.eup %1976 }
0x1569   :  { %v1616_v11 = vadd.f32 1.0, %v1977_v9 }
0x156b   :  { %1978 = vrcp.f32 %v1616_v11  ;;  %v1628_v46 = vand.u32 2147483648, %v1616_v11  ;;  %v1626_v53 = vand.u32 2147483647, %v1616_v11  ;;  %vm1622_vm6 = vweird.f32 %v1616_v11 }
0x156d   :  { %v1629_v17 = vor.u32 1.1754944e-38, %v1628_v46  ;;  %vm1627_vm8 = vcmp.eq.f32.partialorder %v1626_v53, 8.507059e+37 }
0x1571   :  { %v1979_v50 = vpop.eup %1978 }
0x1572   :  { %v1618_v13 = vmul.f32 %v1979_v50, %v1616_v11  ;;  %vm1623_vm5 = vweird.f32 %v1979_v50 }
0x1573   :  { %vm1624_vm7 = vmor %vm1622_vm6, %vm1623_vm5 }
0x1574   :  { %v1619_v14 = vsub.f32 1.0, %v1618_v13 }
0x1576   :  { %v1620_v15 = vmul.f32 %v1979_v50, %v1619_v14 }
0x1578   :  { %v1621_v16 = vadd.f32 %v1979_v50, %v1620_v15 }
0x157a   :  { %v1625_v19 = vsel %vm1624_vm7, %v1979_v50, %v1621_v16 }
0x157b   :  { %v1630_v20 = vsel %vm1627_vm8, %v1629_v17, %v1625_v19 }
0x157c   :  { %v1632_v21 = vmul.f32 %v1630_v20, %v1585_v7 }
0x157e   :  { %v1633_v23 = vmul.f32 %v1632_v21, %v1610_v22 }
0x1580   :  { %1921 = vmatmul.msk.f32.vlgmr.msra.gmra.mxu1 %vm835_vm13, %v1633_v23 }
0x15fd   :  { %v1663_v24 = vpop.f32.mrf.mxu1 }
0x15fe   :  { %v1666_v25 = vadd.f32 %v1663_v24, %v2582_v35 }
0x1600   :  { %v1668_v26 = vmul.f32 %v1666_v25, %v1666_v25 }
0x1602   :  { %v1669_v28 = vsel %vm47_vm0, %v1668_v26, 0.0 }
0x1603   :  { %1670 = vadd.xlane.f32.xlu2 %v1669_v28 }
0x1676   :  { %v1671_v10 = vpop.xlane.xlu2 %1670 }
0x1677   :  { %v1672_v34 = vmul.f32 %v1671_v10, %v2115_v27 }
0x1679   :  { %v1673_v35 = vadd.f32 1e-06, %v1672_v34 }
0x167b   :  { %1980 = vrsqrt.f32 %v1673_v35  ;;  %vm1680_vm10 = vweird.f32 %v1673_v35 }
0x1681   :  { %v1981_v36 = vpop.eup %1980 }
0x1682   :  { %v1675_v37 = vmul.f32 %v1981_v36, %v1673_v35  ;;  %vm1681_vm9 = vweird.f32 %v1981_v36 }
0x1683   :  { %vm1682_vm11 = vmor %vm1680_vm10, %vm1681_vm9 }
0x1684   :  { %v1676_v38 = vmul.f32 %v1981_v36, %v1675_v37 }
0x1686   :  { %v1677_v39 = vmul.f32 0.5, %v1676_v38 }
0x1688   :  { %v1678_v18 = vsub.f32 1.5, %v1677_v39 }
0x168a   :  { %v1679_v40 = vmul.f32 %v1981_v36, %v1678_v18 }
0x168c   :  { %v1683_v42 = vsel %vm1682_vm11, %v1981_v36, %v1679_v40 }
0x168d   :  { %v1684_v43 = vmul.f32 %v1683_v42, %v1666_v25 }
0x168f   :  { %v1688_v44 = vmul.f32 %v1929_v41, %v1684_v43 }
0x1691   :  { %1922 = vmatmul.msk.f32.vlgmr.msrb.gmra.mxu2 %vm47_vm0, %v1688_v44  ;;  %1923 = vmatmul.msk.f32.vlgmr.msra.gmra.mxu3 %vm47_vm0, %v1688_v44 }
0x1714   :  { %v1717_v27 = vpop.f32.mrf.mxu2  ;;  %v1737_v45 = vpop.f32.mrf.mxu3 }
0x1715   :  { %1740 = vst [vmem:[%s2694_s13] sm:$0xff] %v1717_v27 }
0x1716   :  { %1741 = vst [vmem:[%s2694_s13 + $0x8] sm:$0xff] %v1737_v45 }

</bundles_post_ra>
